<compile_context>
chip_gen: v6e
topology: v6e:2x2x1
jax: 0.10.0
libtpu: 0.0.40
codegen_flags: <defaults>
</compile_context>

<pallas_src>
import jax
import jax.numpy as jnp
from jax.experimental import pallas as pl
from jax.experimental.pallas import tpu as pltpu


LANES = 128  # lane-dense output width
HPAD = 128   # fc1 hidden dim padded to a full lane tile


# -----------------------------------------------------------------------------
# Pallas kernel: one batch block (tb samples) per grid step.
# -----------------------------------------------------------------------------
def cnn_kernel(x_ref,     # (tb, T, F)    f32   raw input (channel-last)
               w1_ref,    # (3F, C)       bf16  conv1 weight with BN folded in
               b1_ref,    # (1, C)        f32   conv1 bias with BN folded in
               w2_ref,    # (3C, C)       bf16
               b2_ref,    # (1, C)        f32
               wfc1_ref,  # (Thalf*C, HP) bf16  (PyTorch c*Thalf+p order folded in)
               bfc1_ref,  # (1, HP)       f32
               wfc2_ref,  # (HP, 128)     bf16  lane-padded
               bfc2_ref,  # (1, 128)      f32   lane-padded
               out_ref):  # (tb, 128)     f32
    tb, T, F = x_ref.shape
    C = w2_ref.shape[1]
    Thalf = T // 2

    # ---- conv1 (kernel_size=3, padding=1): in-kernel im2col, single matmul ----
    x = x_ref[...]
    zx = jnp.zeros((tb, 1, F), jnp.float32)
    xp = jnp.concatenate([zx, x, zx], axis=1)                        # (tb, T+2, F)
    x2 = jnp.concatenate([xp[:, k:k + T, :] for k in range(3)],
                         axis=-1)                                    # (tb, T, 3F)
    a1 = jnp.dot(x2.reshape(tb * T, 3 * F).astype(jnp.bfloat16), w1_ref[...],
                 preferred_element_type=jnp.float32) + b1_ref[...]
    # BatchNorm1d (eval) already folded into w1/b1 -> just ReLU here.
    h1 = jnp.maximum(a1, 0.0).reshape(tb, T, C)

    # ---- conv2 (kernel_size=3, padding=1): tap concat in registers, 1 matmul ----
    zc = jnp.zeros((tb, 1, C), jnp.float32)
    h1p = jnp.concatenate([zc, h1, zc], axis=1)                      # (tb, T+2, C)
    h2in = jnp.concatenate([h1p[:, k:k + T, :] for k in range(3)],
                           axis=-1)                                  # (tb, T, 3C)
    a2 = jnp.dot(h2in.reshape(tb * T, 3 * C).astype(jnp.bfloat16), w2_ref[...],
                 preferred_element_type=jnp.float32) + b2_ref[...]
    h2 = jnp.maximum(a2, 0.0).reshape(tb, T, C)

    # ---- MaxPool1d(2) over time + flatten in p*C + c order (matches wfc1) ----
    if T != 2 * Thalf:               # PyTorch floor semantics: drop trailing step
        h2 = h2[:, : 2 * Thalf, :]
    pooled = jnp.max(h2.reshape(tb, Thalf, 2, C), axis=2).reshape(tb, Thalf * C)

    # ---- fc1 (+ReLU), fc2 — both lane-dense (HP=128 hidden, 128 out lanes) ----
    z1 = jnp.maximum(
        jnp.dot(pooled.astype(jnp.bfloat16), wfc1_ref[...],
                preferred_element_type=jnp.float32) + bfc1_ref[...], 0.0)
    # dropout_cnn / dropout_fc: identity in eval mode.
    out_ref[...] = jnp.dot(z1.astype(jnp.bfloat16), wfc2_ref[...],
                           preferred_element_type=jnp.float32) + bfc2_ref[...]


# -----------------------------------------------------------------------------
# Wrapper: converts PyTorch-layout params to kernel layout and calls pallas.
# -----------------------------------------------------------------------------
def cnn_forward(x, pt, eps=1e-5, batch_block=None):
    """x: (B, T, F) float32 — same as the PyTorch input before the permute."""
    B, T, F = x.shape
    C = pt["w1"].shape[0]          # 64
    H = pt["wfc1"].shape[0]        # 100
    NCLS = pt["wfc2"].shape[0]     # 13
    Thalf = T // 2

    # Batch block: aim for tb*T >= 256 MXU rows per grid step, but never pad a
    # small batch beyond itself (at B=16, T=8 -> tb=16, grid=1).  For large B
    # the grid has many blocks, so ("parallel",) shards them across v7x's TCs.
    if batch_block is None:
        tb = max(8, min(pl.cdiv(256, T), pl.cdiv(B, 8) * 8))
    else:
        tb = batch_block
    b_pad = pl.cdiv(B, tb) * tb

    # ----- layout conversions (pure glue, f32 math, bf16 cast at the end) -----
    xp = jnp.pad(x, ((0, b_pad - B), (0, 0), (0, 0))) if b_pad != B else x

    # Fold BatchNorm1d (eval) into conv1: scale per output channel, shift into bias.
    bn_scale = pt["bn_gamma"] / jnp.sqrt(pt["bn_var"] + eps)                 # (C,)
    w1_fold = pt["w1"] * bn_scale[:, None, None]                             # (C,F,3)
    b1_fold = (pt["b1"] - pt["bn_mean"]) * bn_scale + pt["bn_beta"]          # (C,)
    w1_k = jnp.transpose(w1_fold, (2, 1, 0)).reshape(3 * F, C).astype(jnp.bfloat16)
    w2_k = jnp.transpose(pt["w2"], (2, 1, 0)).reshape(3 * C, C).astype(jnp.bfloat16)

    # fc1: PyTorch flatten index is c*Thalf + p  ->  kernel index p*C + c;
    # hidden dim zero-padded 100 -> 128 (numerically identical, lane-dense).
    wfc1_r = (jnp.transpose(pt["wfc1"].reshape(H, C, Thalf), (2, 1, 0))
              .reshape(Thalf * C, H))
    wfc1_k = (jnp.zeros((Thalf * C, HPAD), jnp.float32)
              .at[:, :H].set(wfc1_r).astype(jnp.bfloat16))
    bfc1_k = jnp.zeros((1, HPAD), jnp.float32).at[0, :H].set(pt["bfc1"])
    # fc2: rows padded to 128 (matching padded hidden), cols padded to 128 lanes.
    wfc2_k = (jnp.zeros((HPAD, LANES), jnp.float32)
              .at[:H, :NCLS].set(pt["wfc2"].T).astype(jnp.bfloat16))
    bfc2_k = jnp.zeros((1, LANES), jnp.float32).at[0, :NCLS].set(pt["bfc2"])

    args = (
        xp,
        w1_k, b1_fold.reshape(1, C).astype(jnp.float32),
        w2_k, pt["b2"].reshape(1, C).astype(jnp.float32),
        wfc1_k, bfc1_k,
        wfc2_k, bfc2_k,
    )

    const2 = lambda i: (0, 0)      # grid-invariant weight blocks: DMA'd once
    in_specs = [
        pl.BlockSpec((tb, T, F), lambda i: (i, 0, 0)),
        pl.BlockSpec((3 * F, C), const2),
        pl.BlockSpec((1, C), const2),
        pl.BlockSpec((3 * C, C), const2),
        pl.BlockSpec((1, C), const2),
        pl.BlockSpec((Thalf * C, HPAD), const2),
        pl.BlockSpec((1, HPAD), const2),
        pl.BlockSpec((HPAD, LANES), const2),
        pl.BlockSpec((1, LANES), const2),
    ]

    out = pl.pallas_call(
        cnn_kernel,
        out_shape=jax.ShapeDtypeStruct((b_pad, LANES), jnp.float32),
        grid=(b_pad // tb,),
        in_specs=in_specs,
        out_specs=pl.BlockSpec((tb, LANES), lambda i: (i, 0)),
        compiler_params=pltpu.CompilerParams(
            dimension_semantics=("parallel",)),
    )(*args)
    return out[:B, :NCLS]


# -----------------------------------------------------------------------------
# Pure-JAX reference (mirrors the PyTorch forward in eval mode, NCW layout).
# -----------------------------------------------------------------------------
def reference_forward(x, pt, eps=1e-5):
    xt = jnp.transpose(x, (0, 2, 1))                                # (B,F,T)

    def conv1d(inp, w, b):
        out = jax.lax.conv_general_dilated(
            inp, w, window_strides=(1,), padding=((1, 1),),
            dimension_numbers=("NCH", "OIH", "NCH"),
            precision=jax.lax.Precision.HIGHEST)
        return out + b[None, :, None]

    h = conv1d(xt, pt["w1"], pt["b1"])
    h = ((h - pt["bn_mean"][None, :, None])
         / jnp.sqrt(pt["bn_var"][None, :, None] + eps)
         * pt["bn_gamma"][None, :, None] + pt["bn_beta"][None, :, None])
    h = jnp.maximum(h, 0.0)
    h = jnp.maximum(conv1d(h, pt["w2"], pt["b2"]), 0.0)
    B, C, T = h.shape
    pooled = jnp.max(h.reshape(B, C, T // 2, 2), axis=-1)
    flat = pooled.reshape(B, -1)
    z1 = jnp.maximum(
        jnp.dot(flat, pt["wfc1"].T, precision=jax.lax.Precision.HIGHEST)
        + pt["bfc1"], 0.0)
    return (jnp.dot(z1, pt["wfc2"].T, precision=jax.lax.Precision.HIGHEST)
            + pt["bfc2"])


if __name__ == "__main__":
    B, T, F = 16, 8, 8         # batch, time_steps, num_features
    C, H, NCLS = 64, 100, 13   # conv channels, fc1 hidden, num_classes

    key = jax.random.PRNGKey(0)
    keys = jax.random.split(key, 16)

    # Deterministic PyTorch-layout parameters.
    pt_params = {
        "w1": jax.random.normal(keys[0], (C, F, 3), jnp.float32) * 0.1,
        "b1": jax.random.normal(keys[1], (C,), jnp.float32) * 0.1,
        "bn_gamma": 1.0 + jax.random.normal(keys[2], (C,), jnp.float32) * 0.1,
        "bn_beta": jax.random.normal(keys[3], (C,), jnp.float32) * 0.1,
        "bn_mean": jax.random.normal(keys[4], (C,), jnp.float32) * 0.1,
        "bn_var": jnp.abs(jax.random.normal(keys[5], (C,), jnp.float32)) * 0.5 + 0.5,
        "w2": jax.random.normal(keys[6], (C, C, 3), jnp.float32) * 0.1,
        "b2": jax.random.normal(keys[7], (C,), jnp.float32) * 0.1,
        "wfc1": jax.random.normal(keys[8], (H, C * (T // 2)), jnp.float32) * 0.05,
        "bfc1": jax.random.normal(keys[9], (H,), jnp.float32) * 0.1,
        "wfc2": jax.random.normal(keys[10], (NCLS, H), jnp.float32) * 0.1,
        "bfc2": jax.random.normal(keys[11], (NCLS,), jnp.float32) * 0.1,
    }

    x = jax.random.normal(keys[12], (B, T, F), jnp.float32)

    out = cnn_forward(x, pt_params)
    out = jax.block_until_ready(out)

    ref = reference_forward(x, pt_params)
    assert out.shape == (B, NCLS)
    # Kernel feeds the MXU bf16 operands (f32 accumulation, BN folded in f32
    # before the bf16 cast), so compare against f32 reference with bf16 tolerance.
    assert jnp.allclose(out, ref, atol=2e-2, rtol=2e-2), (
        f"mismatch: max abs err {jnp.max(jnp.abs(out - ref))}")

    # TODO(synk): Dropout / BatchNorm training-mode (batch statistics) are not
    # implemented; kernel reproduces eval-mode inference semantics.
    print("KERNEL_OK")
</pallas_src>

<mosaic_0001>
module attributes {stable_mosaic.version = 11 : i64} {
  func.func @cnn_kernel(%arg0: i32, %arg1: memref<16x8x8xf32, #tpu.memory_space<vmem>>, %arg2: memref<24x64xbf16, #tpu.memory_space<vmem>>, %arg3: memref<1x64xf32, #tpu.memory_space<vmem>>, %arg4: memref<192x64xbf16, #tpu.memory_space<vmem>>, %arg5: memref<1x64xf32, #tpu.memory_space<vmem>>, %arg6: memref<256x128xbf16, #tpu.memory_space<vmem>>, %arg7: memref<1x128xf32, #tpu.memory_space<vmem>>, %arg8: memref<128x128xbf16, #tpu.memory_space<vmem>>, %arg9: memref<1x128xf32, #tpu.memory_space<vmem>>, %arg10: memref<16x128xf32, #tpu.memory_space<vmem>>) attributes {dimension_semantics = [#tpu.dimension_semantics<parallel>], iteration_bounds = array<i64: 1>, scalar_prefetch = 0 : i64, scratch_operands = 0 : i64, tpu.core_type = #tpu.core_type<tc>, window_params = [{transform_indices = @transform_0, window_bounds = array<i64: 16, 8, 8>}, {pipeline_mode = #tpu.pipeline_mode<synchronous>, transform_indices = @transform_1, window_bounds = array<i64: 24, 64>}, {pipeline_mode = #tpu.pipeline_mode<synchronous>, transform_indices = @transform_2, window_bounds = array<i64: 1, 64>}, {pipeline_mode = #tpu.pipeline_mode<synchronous>, transform_indices = @transform_3, window_bounds = array<i64: 192, 64>}, {pipeline_mode = #tpu.pipeline_mode<synchronous>, transform_indices = @transform_4, window_bounds = array<i64: 1, 64>}, {pipeline_mode = #tpu.pipeline_mode<synchronous>, transform_indices = @transform_5, window_bounds = array<i64: 256, 128>}, {pipeline_mode = #tpu.pipeline_mode<synchronous>, transform_indices = @transform_6, window_bounds = array<i64: 1, 128>}, {pipeline_mode = #tpu.pipeline_mode<synchronous>, transform_indices = @transform_7, window_bounds = array<i64: 128, 128>}, {pipeline_mode = #tpu.pipeline_mode<synchronous>, transform_indices = @transform_8, window_bounds = array<i64: 1, 128>}, {transform_indices = @transform_9, window_bounds = array<i64: 16, 128>}]} {
    %c0 = arith.constant 0 : index
    %c0_0 = arith.constant 0 : index
    %c0_1 = arith.constant 0 : index
    %0 = vector.load %arg1[%c0, %c0_0, %c0_1] : memref<16x8x8xf32, #tpu.memory_space<vmem>>, vector<16x8x8xf32>
    %cst = arith.constant 0.000000e+00 : f32
    %1 = vector.broadcast %cst : f32 to vector<16x1x8xf32>
    %2 = tpu.concatenate %1, %0, %1 in 1 : vector<16x1x8xf32>, vector<16x8x8xf32>, vector<16x1x8xf32> -> vector<16x10x8xf32>
    %3 = vector.extract_strided_slice %2 {offsets = [0, 0, 0], sizes = [16, 8, 8], strides = [1, 1, 1]} : vector<16x10x8xf32> to vector<16x8x8xf32>
    %4 = vector.extract_strided_slice %2 {offsets = [0, 1, 0], sizes = [16, 8, 8], strides = [1, 1, 1]} : vector<16x10x8xf32> to vector<16x8x8xf32>
    %5 = vector.extract_strided_slice %2 {offsets = [0, 2, 0], sizes = [16, 8, 8], strides = [1, 1, 1]} : vector<16x10x8xf32> to vector<16x8x8xf32>
    %6 = tpu.concatenate %3, %4, %5 in 2 : vector<16x8x8xf32>, vector<16x8x8xf32>, vector<16x8x8xf32> -> vector<16x8x24xf32>
    %7 = vector.shape_cast %6 : vector<16x8x24xf32> to vector<128x24xf32>
    %8 = arith.truncf %7 : vector<128x24xf32> to vector<128x24xbf16>
    %c0_2 = arith.constant 0 : index
    %c0_3 = arith.constant 0 : index
    %9 = vector.load %arg2[%c0_2, %c0_3] : memref<24x64xbf16, #tpu.memory_space<vmem>>, vector<24x64xbf16>
    %cst_4 = arith.constant dense<0.000000e+00> : vector<128x64xf32>
    %10 = tpu.matmul %8, %9, %cst_4 {dimension_numbers = #tpu.dot_dimension_numbers<[1], [0], [0], [1], [0, 0, 1, 1], [], []>} : vector<128x24xbf16>, vector<24x64xbf16>, vector<128x64xf32> -> vector<128x64xf32>
    %c0_5 = arith.constant 0 : index
    %c0_6 = arith.constant 0 : index
    %11 = vector.load %arg3[%c0_5, %c0_6] : memref<1x64xf32, #tpu.memory_space<vmem>>, vector<1x64xf32>
    %12 = vector.broadcast %11 : vector<1x64xf32> to vector<128x64xf32>
    %13 = arith.addf %10, %12 : vector<128x64xf32>
    %cst_7 = arith.constant 0.000000e+00 : f32
    %14 = vector.broadcast %cst_7 : f32 to vector<128x64xf32>
    %15 = arith.maximumf %13, %14 : vector<128x64xf32>
    %16 = vector.shape_cast %15 : vector<128x64xf32> to vector<16x8x64xf32>
    %cst_8 = arith.constant 0.000000e+00 : f32
    %17 = vector.broadcast %cst_8 : f32 to vector<16x1x64xf32>
    %18 = tpu.concatenate %17, %16, %17 in 1 : vector<16x1x64xf32>, vector<16x8x64xf32>, vector<16x1x64xf32> -> vector<16x10x64xf32>
    %19 = vector.extract_strided_slice %18 {offsets = [0, 0, 0], sizes = [16, 8, 64], strides = [1, 1, 1]} : vector<16x10x64xf32> to vector<16x8x64xf32>
    %20 = vector.extract_strided_slice %18 {offsets = [0, 1, 0], sizes = [16, 8, 64], strides = [1, 1, 1]} : vector<16x10x64xf32> to vector<16x8x64xf32>
    %21 = vector.extract_strided_slice %18 {offsets = [0, 2, 0], sizes = [16, 8, 64], strides = [1, 1, 1]} : vector<16x10x64xf32> to vector<16x8x64xf32>
    %22 = tpu.concatenate %19, %20, %21 in 2 : vector<16x8x64xf32>, vector<16x8x64xf32>, vector<16x8x64xf32> -> vector<16x8x192xf32>
    %23 = vector.shape_cast %22 : vector<16x8x192xf32> to vector<128x192xf32>
    %24 = arith.truncf %23 : vector<128x192xf32> to vector<128x192xbf16>
    %c0_9 = arith.constant 0 : index
    %c0_10 = arith.constant 0 : index
    %25 = vector.load %arg4[%c0_9, %c0_10] : memref<192x64xbf16, #tpu.memory_space<vmem>>, vector<192x64xbf16>
    %cst_11 = arith.constant dense<0.000000e+00> : vector<128x64xf32>
    %26 = tpu.matmul %24, %25, %cst_11 {dimension_numbers = #tpu.dot_dimension_numbers<[1], [0], [0], [1], [0, 0, 1, 1], [], []>} : vector<128x192xbf16>, vector<192x64xbf16>, vector<128x64xf32> -> vector<128x64xf32>
    %c0_12 = arith.constant 0 : index
    %c0_13 = arith.constant 0 : index
    %27 = vector.load %arg5[%c0_12, %c0_13] : memref<1x64xf32, #tpu.memory_space<vmem>>, vector<1x64xf32>
    %28 = vector.broadcast %27 : vector<1x64xf32> to vector<128x64xf32>
    %29 = arith.addf %26, %28 : vector<128x64xf32>
    %cst_14 = arith.constant 0.000000e+00 : f32
    %30 = vector.broadcast %cst_14 : f32 to vector<128x64xf32>
    %31 = arith.maximumf %29, %30 : vector<128x64xf32>
    %32 = vector.shape_cast %31 : vector<128x64xf32> to vector<16x8x64xf32>
    %33 = vector.shape_cast %32 : vector<16x8x64xf32> to vector<16x4x2x64xf32>
    %cst_15 = arith.constant dense<0xFF800000> : vector<16x4x64xf32>
    %34 = vector.multi_reduction <maximumf>, %33, %cst_15 [2] : vector<16x4x2x64xf32> to vector<16x4x64xf32>
    %35 = vector.shape_cast %34 : vector<16x4x64xf32> to vector<16x256xf32>
    %36 = arith.truncf %35 : vector<16x256xf32> to vector<16x256xbf16>
    %c0_16 = arith.constant 0 : index
    %c0_17 = arith.constant 0 : index
    %37 = vector.load %arg6[%c0_16, %c0_17] : memref<256x128xbf16, #tpu.memory_space<vmem>>, vector<256x128xbf16>
    %cst_18 = arith.constant dense<0.000000e+00> : vector<16x128xf32>
    %38 = tpu.matmul %36, %37, %cst_18 {dimension_numbers = #tpu.dot_dimension_numbers<[1], [0], [0], [1], [0, 0, 1, 1], [], []>} : vector<16x256xbf16>, vector<256x128xbf16>, vector<16x128xf32> -> vector<16x128xf32>
    %c0_19 = arith.constant 0 : index
    %c0_20 = arith.constant 0 : index
    %39 = vector.load %arg7[%c0_19, %c0_20] : memref<1x128xf32, #tpu.memory_space<vmem>>, vector<1x128xf32>
    %40 = vector.broadcast %39 : vector<1x128xf32> to vector<16x128xf32>
    %41 = arith.addf %38, %40 : vector<16x128xf32>
    %cst_21 = arith.constant 0.000000e+00 : f32
    %42 = vector.broadcast %cst_21 : f32 to vector<16x128xf32>
    %43 = arith.maximumf %41, %42 : vector<16x128xf32>
    %44 = arith.truncf %43 : vector<16x128xf32> to vector<16x128xbf16>
    %c0_22 = arith.constant 0 : index
    %c0_23 = arith.constant 0 : index
    %45 = vector.load %arg8[%c0_22, %c0_23] : memref<128x128xbf16, #tpu.memory_space<vmem>>, vector<128x128xbf16>
    %cst_24 = arith.constant dense<0.000000e+00> : vector<16x128xf32>
    %46 = tpu.matmul %44, %45, %cst_24 {dimension_numbers = #tpu.dot_dimension_numbers<[1], [0], [0], [1], [0, 0, 1, 1], [], []>} : vector<16x128xbf16>, vector<128x128xbf16>, vector<16x128xf32> -> vector<16x128xf32>
    %c0_25 = arith.constant 0 : index
    %c0_26 = arith.constant 0 : index
    %47 = vector.load %arg9[%c0_25, %c0_26] : memref<1x128xf32, #tpu.memory_space<vmem>>, vector<1x128xf32>
    %48 = vector.broadcast %47 : vector<1x128xf32> to vector<16x128xf32>
    %49 = arith.addf %46, %48 : vector<16x128xf32>
    %c0_27 = arith.constant 0 : index
    %c0_28 = arith.constant 0 : index
    %50 = vector.load %arg10[%c0_27, %c0_28] : memref<16x128xf32, #tpu.memory_space<vmem>>, vector<16x128xf32>
    tpu.vector_store %arg10[%c0_27, %c0_28], %49 {strides = array<i32>} : memref<16x128xf32, #tpu.memory_space<vmem>>, vector<16x128xf32>,
    return
  }
  func.func @transform_0(%arg0: i32) -> (i32, i32, i32) {
    %c0_i32 = arith.constant 0 : i32
    %c0_i32_0 = arith.constant 0 : i32
    %c0_i32_1 = arith.constant 0 : i32
    return %arg0, %c0_i32, %c0_i32_0 : i32, i32, i32
  }
  func.func @transform_1(%arg0: i32) -> (i32, i32) {
    %c0_i32 = arith.constant 0 : i32
    %c0_i32_0 = arith.constant 0 : i32
    %c0_i32_1 = arith.constant 0 : i32
    return %c0_i32, %c0_i32_0 : i32, i32
  }
  func.func @transform_2(%arg0: i32) -> (i32, i32) {
    %c0_i32 = arith.constant 0 : i32
    %c0_i32_0 = arith.constant 0 : i32
    %c0_i32_1 = arith.constant 0 : i32
    return %c0_i32, %c0_i32_0 : i32, i32
  }
  func.func @transform_3(%arg0: i32) -> (i32, i32) {
    %c0_i32 = arith.constant 0 : i32
    %c0_i32_0 = arith.constant 0 : i32
    %c0_i32_1 = arith.constant 0 : i32
    return %c0_i32, %c0_i32_0 : i32, i32
  }
  func.func @transform_4(%arg0: i32) -> (i32, i32) {
    %c0_i32 = arith.constant 0 : i32
    %c0_i32_0 = arith.constant 0 : i32
    %c0_i32_1 = arith.constant 0 : i32
    return %c0_i32, %c0_i32_0 : i32, i32
  }
  func.func @transform_5(%arg0: i32) -> (i32, i32) {
    %c0_i32 = arith.constant 0 : i32
    %c0_i32_0 = arith.constant 0 : i32
    %c0_i32_1 = arith.constant 0 : i32
    return %c0_i32, %c0_i32_0 : i32, i32
  }
  func.func @transform_6(%arg0: i32) -> (i32, i32) {
    %c0_i32 = arith.constant 0 : i32
    %c0_i32_0 = arith.constant 0 : i32
    %c0_i32_1 = arith.constant 0 : i32
    return %c0_i32, %c0_i32_0 : i32, i32
  }
  func.func @transform_7(%arg0: i32) -> (i32, i32) {
    %c0_i32 = arith.constant 0 : i32
    %c0_i32_0 = arith.constant 0 : i32
    %c0_i32_1 = arith.constant 0 : i32
    return %c0_i32, %c0_i32_0 : i32, i32
  }
  func.func @transform_8(%arg0: i32) -> (i32, i32) {
    %c0_i32 = arith.constant 0 : i32
    %c0_i32_0 = arith.constant 0 : i32
    %c0_i32_1 = arith.constant 0 : i32
    return %c0_i32, %c0_i32_0 : i32, i32
  }
  func.func @transform_9(%arg0: i32) -> (i32, i32) {
    %c0_i32 = arith.constant 0 : i32
    %c0_i32_0 = arith.constant 0 : i32
    return %arg0, %c0_i32 : i32, i32
  }
}

</mosaic_0001>

<bundles_post_ra>
// kernel: tpu_custom_call.1
= control target key start
LH: loop header
LB: loop body
LE: loop exit
PB: predicated region body
PF: predicated region fallthrough
CT: control target
= control target key end

     0   :  { %vm98_vm0 = vcmask 1040384   ;;  %vm163_vm1 = vcmask 1046528   ;;  %vm260_vm2 = vcmask 1045504   ;;  %s2845_s21 = smov 8   ;;  %s2846_s24 = smov 16   ;;  %vm443_vm3 = vcmask 1043456   ;;  %s3866_s0 = inlined_call_operand.vmem [shape: f32[16,8,8], index: 0, kind: input, shape index: {}]   ;;  %s3867_s1 = inlined_call_operand.vmem [shape: bf16[24,64], index: 1, kind: input, shape index: {}]   ;;  %s3868_s2 = inlined_call_operand.vmem [shape: f32[1,64], index: 2, kind: input, shape index: {}]   ;;  %s3869_s3 = inlined_call_operand.vmem [shape: bf16[192,64], index: 3, kind: input, shape index: {}]   ;;  %s3870_s4 = inlined_call_operand.vmem [shape: f32[1,64], index: 4, kind: input, shape index: {}]   ;;  %s3871_s5 = inlined_call_operand.vmem [shape: bf16[256,128], index: 5, kind: input, shape index: {}]   ;;  %s3872_s6 = inlined_call_operand.vmem [shape: f32[1,128], index: 6, kind: input, shape index: {}]   ;;  %s3873_s7 = inlined_call_operand.vmem [shape: bf16[128,128], index: 7, kind: input, shape index: {}]   ;;  %s3874_s8 = inlined_call_operand.vmem [shape: f32[1,128], index: 8, kind: input, shape index: {}]   ;;  %s3875_s9 = inlined_call_operand.hbm [shape: f32[16,128], index: 9, kind: output, shape index: {}]  }
   0x1   :  { %v34_v0 = vld [vmem:[%s3866_s0] sm:$0xff]  ;;  %v35_v1 = vld [vmem:[%s3866_s0 + $0x8] sm:$0xff]  ;;  %v36_v4 = vld [vmem:[%s3866_s0 + $0x10] sm:$0xff] }
   0x2   :  { %v66_v2 = vrot.slane %v34_v0, 7  ;;  %v67_v3 = vrot.slane %v35_v1, 7  ;;  %v37_v5 = vld [vmem:[%s3866_s0 + $0x18] sm:$0xff]  ;;  %v38_v6 = vld [vmem:[%s3866_s0 + $0x20] sm:$0xff]  ;;  %v68_v7 = vrot.slane %v36_v4, 7  ;;  %v39_v30 = vld [vmem:[%s3866_s0 + $0x28] sm:$0xff] }
   0x3   :  { %v69_v8 = vrot.slane %v37_v5, 7  ;;  %v70_v9 = vrot.slane %v38_v6, 7  ;;  %v40_v39 = vld [vmem:[%s3866_s0 + $0x30] sm:$0xff]  ;;  %v71_v43 = vrot.slane %v39_v30, 7  ;;  %v41_v44 = vld [vmem:[%s3866_s0 + $0x38] sm:$0xff]  ;;  %v42_v1 = vld [vmem:[%s3866_s0 + $0x40] sm:$0xff] }
   0x4   :  { %v2921_v10 = vsel %vm98_vm0, 0.0, %v66_v2  ;;  %v2924_v11 = vsel %vm98_vm0, 0.0, %v67_v3  ;;  %v115_v12 = vsel %vm98_vm0, %v66_v2, 0.0  ;;  %v116_v13 = vsel %vm98_vm0, %v67_v3, 0.0  ;;  %v43_v6 = vld [vmem:[%s3866_s0 + $0x48] sm:$0xff] }
   0x5   :  { %v164_v14 = vrot.slane %v2921_v10, 1  ;;  %v165_v15 = vrot.slane %v115_v12, 1  ;;  %v167_v16 = vrot.slane %v2924_v11, 1  ;;  %v168_v17 = vrot.slane %v116_v13, 1 }
   0x6   :  { %v261_v18 = vrot.slane %v2921_v10, 2  ;;  %v262_v19 = vrot.slane %v115_v12, 2  ;;  %v264_v20 = vrot.slane %v2924_v11, 2  ;;  %v265_v21 = vrot.slane %v116_v13, 2 }
   0x7   :  { %v166_v22 = vsel %vm163_vm1, %v164_v14, %v165_v15  ;;  %v169_v23 = vsel %vm163_vm1, %v167_v16, %v168_v17  ;;  %v2935_v24 = vsel %vm98_vm0, 0.0, %v68_v7  ;;  %v2938_v25 = vsel %vm98_vm0, 0.0, %v69_v8  ;;  %v45_v14 = vld [vmem:[%s3866_s0 + $0x58] sm:$0xff] }
   0x8   :  { %v2654_v26 = vpack.i.bf16 %v169_v23, %v166_v22  ;;  %v263_v27 = vsel %vm260_vm2, %v261_v18, %v262_v19  ;;  %v266_v28 = vsel %vm260_vm2, %v264_v20, %v265_v21  ;;  %v117_v29 = vsel %vm98_vm0, %v68_v7, 0.0  ;;  %v44_v7 = vld [vmem:[%s3866_s0 + $0x50] sm:$0xff] }
   0x9   :  { %v2664_v31 = vpack.i.bf16 %v266_v28, %v263_v27  ;;  %v118_v32 = vsel %vm98_vm0, %v69_v8, 0.0  ;;  %v170_v33 = vrot.slane %v2935_v24, 1  ;;  %v171_v34 = vrot.slane %v117_v29, 1 }
   0xa   :  { %2655 = vrot.lane.b32.xlu0 %v2654_v26, %s2845_s21  ;;  %v173_v35 = vrot.slane %v2938_v25, 1  ;;  %v174_v36 = vrot.slane %v118_v32, 1  ;;  %v267_v37 = vrot.slane %v2935_v24, 2  ;;  %v268_v38 = vrot.slane %v117_v29, 2 }
   0xb   :  { %2665 = vrot.lane.b32.xlu1 %v2664_v31, %s2846_s24  ;;  %v172_v40 = vsel %vm163_vm1, %v170_v33, %v171_v34  ;;  %v270_v41 = vrot.slane %v2938_v25, 2  ;;  %v271_v42 = vrot.slane %v118_v32, 2  ;;  %v2963_v47 = vsel %vm98_vm0, 0.0, %v70_v9 }
   0xc   :  { %v175_v45 = vsel %vm163_vm1, %v173_v35, %v174_v36  ;;  %v269_v46 = vsel %vm260_vm2, %v267_v37, %v268_v38  ;;  %v119_v48 = vsel %vm98_vm0, %v70_v9, 0.0  ;;  %v2968_v51 = vsel %vm98_vm0, 0.0, %v71_v43 }
   0xd   :  { %v2659_v49 = vpack.i.bf16 %v175_v45, %v172_v40  ;;  %v272_v50 = vsel %vm260_vm2, %v270_v41, %v271_v42  ;;  %v120_v52 = vsel %vm98_vm0, %v71_v43, 0.0  ;;  %v176_v54 = vrot.slane %v2963_v47, 1 }
   0xe   :  { %v2669_v53 = vpack.i.bf16 %v272_v50, %v269_v46  ;;  %v177_v55 = vrot.slane %v119_v48, 1  ;;  %v179_v56 = vrot.slane %v2968_v51, 1  ;;  %v180_v57 = vrot.slane %v120_v52, 1  ;;  %v46_v50 = vld [vmem:[%s3866_s0 + $0x60] sm:$0xff] }
   0xf   :  { %2660 = vrot.lane.b32.xlu0 %v2659_v49, %s2845_s21  ;;  %v72_v58 = vrot.slane %v40_v39, 7  ;;  %v73_v59 = vrot.slane %v41_v44, 7  ;;  %v273_v60 = vrot.slane %v2963_v47, 2  ;;  %v274_v62 = vrot.slane %v119_v48, 2 }
  0x10   :  { %2670 = vrot.lane.b32.xlu1 %v2669_v53, %s2846_s24  ;;  %v178_v61 = vsel %vm163_vm1, %v176_v54, %v177_v55  ;;  %v276_v63 = vrot.slane %v2968_v51, 2  ;;  %v277_v0 = vrot.slane %v120_v52, 2  ;;  %v181_v2 = vsel %vm163_vm1, %v179_v56, %v180_v57  ;;  %v47_v56 = vld [vmem:[%s3866_s0 + $0x68] sm:$0xff] }
  0x11   :  { %v2983_v3 = vsel %vm98_vm0, 0.0, %v72_v58  ;;  %v2986_v4 = vsel %vm98_vm0, 0.0, %v73_v59  ;;  %v121_v5 = vsel %vm98_vm0, %v72_v58, 0.0  ;;  %v2674_v8 = vpack.i.bf16 %v181_v2, %v178_v61  ;;  %v48_v61 = vld [vmem:[%s3866_s0 + $0x70] sm:$0xff]  ;;  %v49_v2 = vld [vmem:[%s3866_s0 + $0x78] sm:$0xff] }
  0x12   :  { %v122_v9 = vsel %vm98_vm0, %v73_v59, 0.0  ;;  %v182_v12 = vrot.slane %v2983_v3, 1  ;;  %v183_v13 = vrot.slane %v121_v5, 1  ;;  %v185_v15 = vrot.slane %v2986_v4, 1 }
  0x13   :  { %v186_v16 = vrot.slane %v122_v9, 1  ;;  %v275_v17 = vsel %vm260_vm2, %v273_v60, %v274_v62  ;;  %v278_v18 = vsel %vm260_vm2, %v276_v63, %v277_v0  ;;  %2675 = vrot.lane.b32.xlu0 %v2674_v8, %s2845_s21  ;;  %v279_v21 = vrot.slane %v2983_v3, 2 }
  0x14   :  { %v184_v19 = vsel %vm163_vm1, %v182_v12, %v183_v13  ;;  %v2684_v20 = vpack.i.bf16 %v278_v18, %v275_v17  ;;  %v280_v22 = vrot.slane %v121_v5, 2  ;;  %v282_v26 = vrot.slane %v2986_v4, 2 }
  0x15   :  { %v187_v23 = vsel %vm163_vm1, %v185_v15, %v186_v16  ;;  %v283_v27 = vrot.slane %v122_v9, 2  ;;  %v74_v28 = vrot.slane %v42_v1, 7  ;;  %v75_v31 = vrot.slane %v43_v6, 7 }
  0x16   :  { %v2679_v29 = vpack.i.bf16 %v187_v23, %v184_v19  ;;  %v281_v30 = vsel %vm260_vm2, %v279_v21, %v280_v22  ;;  %v76_v32 = vrot.slane %v44_v7, 7  ;;  %v77_v36 = vrot.slane %v45_v14, 7 }
  0x17   :  { %v284_v33 = vsel %vm260_vm2, %v282_v26, %v283_v27  ;;  %v3011_v34 = vsel %vm98_vm0, 0.0, %v74_v28  ;;  %v123_v35 = vsel %vm98_vm0, %v74_v28, 0.0  ;;  %2685 = vrot.lane.b32.xlu0 %v2684_v20, %s2846_s24  ;;  %v3017_v38 = vsel %vm98_vm0, 0.0, %v75_v31 }
  0x18   :  { %2680 = vrot.lane.b32.xlu1 %v2679_v29, %s2845_s21  ;;  %v2689_v37 = vpack.i.bf16 %v284_v33, %v281_v30  ;;  %v124_v39 = vsel %vm98_vm0, %v75_v31, 0.0  ;;  %v188_v40 = vrot.slane %v3011_v34, 1  ;;  %v189_v41 = vrot.slane %v123_v35, 1 }
  0x19   :  { %v191_v42 = vrot.slane %v3017_v38, 1  ;;  %v192_v43 = vrot.slane %v124_v39, 1  ;;  %v3023_v44 = vsel %vm98_vm0, 0.0, %v76_v32  ;;  %v3026_v45 = vsel %vm98_vm0, 0.0, %v77_v36 }
  0x1a   :  { %v125_v46 = vsel %vm98_vm0, %v76_v32, 0.0  ;;  %v126_v48 = vsel %vm98_vm0, %v77_v36, 0.0  ;;  %v194_v49 = vrot.slane %v3023_v44, 1  ;;  %v190_v52 = vsel %vm163_vm1, %v188_v40, %v189_v41 }
  0x1b   :  { %v193_v53 = vsel %vm163_vm1, %v191_v42, %v192_v43  ;;  %v195_v54 = vrot.slane %v125_v46, 1  ;;  %v197_v55 = vrot.slane %v3026_v45, 1  ;;  %v198_v58 = vrot.slane %v126_v48, 1 }
  0x1c   :  { %2690 = vrot.lane.b32.xlu1 %v2689_v37, %s2846_s24  ;;  %v2694_v57 = vpack.i.bf16 %v193_v53, %v190_v52  ;;  %v285_v59 = vrot.slane %v3011_v34, 2  ;;  %v286_v60 = vrot.slane %v123_v35, 2  ;;  %v288_v63 = vrot.slane %v3017_v38, 2 }
  0x1d   :  { %v196_v62 = vsel %vm163_vm1, %v194_v49, %v195_v54  ;;  %v289_v0 = vrot.slane %v124_v39, 2  ;;  %v291_v1 = vrot.slane %v3023_v44, 2  ;;  %v199_v5 = vsel %vm163_vm1, %v197_v55, %v198_v58  ;;  %v2784_v39 = vld [vmem:[%s3867_s1 + $0x8] ss:$0 sps:$4 sm:$0xff]  }
  0x1e   :  { %2695 = vrot.lane.b32.xlu0 %v2694_v57, %s2845_s21  ;;  %v287_v6 = vsel %vm260_vm2, %v285_v59, %v286_v60  ;;  %v292_v7 = vrot.slane %v125_v46, 2  ;;  %v294_v8 = vrot.slane %v3026_v45, 2  ;;  %v2699_v9 = vpack.i.bf16 %v199_v5, %v196_v62  ;;  %2643 = vmatprep.subr.msk.bf16.mxu0 %vm443_vm3, %v2784_v39 }
  0x1f   :  { %v290_v12 = vsel %vm260_vm2, %v288_v63, %v289_v0  ;;  %v295_v13 = vrot.slane %v126_v48, 2  ;;  %v78_v14 = vrot.slane %v46_v50, 7  ;;  %v79_v17 = vrot.slane %v47_v56, 7  ;;  %v2785_v56 = vld [vmem:[%s3867_s1] sm:$0xff]  }
  0x20   :  { %v2704_v15 = vpack.i.bf16 %v290_v12, %v287_v6  ;;  %v293_v16 = vsel %vm260_vm2, %v291_v1, %v292_v7  ;;  %v80_v18 = vrot.slane %v48_v61, 7  ;;  %2700 = vrot.lane.b32.xlu1 %v2699_v9, %s2845_s21  ;;  %v81_v22 = vrot.slane %v49_v2, 7 }
  0x21   :  { %v296_v19 = vsel %vm260_vm2, %v294_v8, %v295_v13  ;;  %v3060_v20 = vsel %vm98_vm0, 0.0, %v78_v14  ;;  %v127_v21 = vsel %vm98_vm0, %v78_v14, 0.0  ;;  %v3065_v26 = vsel %vm98_vm0, 0.0, %v79_v17 }
  0x22   :  { %2705 = vrot.lane.b32.xlu0 %v2704_v15, %s2846_s24  ;;  %v2709_v23 = vpack.i.bf16 %v296_v19, %v293_v16  ;;  %v128_v27 = vsel %vm98_vm0, %v79_v17, 0.0  ;;  %v200_v28 = vrot.slane %v3060_v20, 1  ;;  %v201_v29 = vrot.slane %v127_v21, 1 }
  0x23   :  { %v203_v30 = vrot.slane %v3065_v26, 1  ;;  %v204_v31 = vrot.slane %v128_v27, 1  ;;  %v3071_v32 = vsel %vm98_vm0, 0.0, %v80_v18  ;;  %v3074_v33 = vsel %vm98_vm0, 0.0, %v81_v22 }
  0x24   :  { %v129_v35 = vsel %vm98_vm0, %v80_v18, 0.0  ;;  %v130_v36 = vsel %vm98_vm0, %v81_v22, 0.0  ;;  %v206_v37 = vrot.slane %v3071_v32, 1  ;;  %2710 = vrot.lane.b32.xlu1 %v2709_v23, %s2846_s24  ;;  %v202_v40 = vsel %vm163_vm1, %v200_v28, %v201_v29 }
  0x25   :  { %v205_v41 = vsel %vm163_vm1, %v203_v30, %v204_v31  ;;  %v207_v42 = vrot.slane %v129_v35, 1  ;;  %v209_v43 = vrot.slane %v3074_v33, 1  ;;  %v210_v48 = vrot.slane %v130_v36, 1 }
  0x26   :  { %v2714_v46 = vpack.i.bf16 %v205_v41, %v202_v40  ;;  %v297_v49 = vrot.slane %v3060_v20, 2  ;;  %v298_v50 = vrot.slane %v127_v21, 2  ;;  %v300_v53 = vrot.slane %v3065_v26, 2 }
  0x27   :  { %v208_v52 = vsel %vm163_vm1, %v206_v37, %v207_v42  ;;  %v301_v54 = vrot.slane %v128_v27, 2  ;;  %v303_v55 = vrot.slane %v3071_v32, 2  ;;  %v211_v57 = vsel %vm163_vm1, %v209_v43, %v210_v48 }
  0x28   :  { %2715 = vrot.lane.b32.xlu0 %v2714_v46, %s2845_s21  ;;  %v299_v58 = vsel %vm260_vm2, %v297_v49, %v298_v50  ;;  %v304_v59 = vrot.slane %v129_v35, 2  ;;  %v306_v60 = vrot.slane %v3074_v33, 2  ;;  %v2719_v61 = vpack.i.bf16 %v211_v57, %v208_v52 }
  0x29   :  { %v302_v62 = vsel %vm260_vm2, %v300_v53, %v301_v54  ;;  %v307_v63 = vrot.slane %v130_v36, 2  ;;  %v445_v2 = vsel %vm443_vm3, %v2784_v39, 0 }
  0x2a   :  { %v2724_v0 = vpack.i.bf16 %v302_v62, %v299_v58  ;;  %v305_v1 = vsel %vm260_vm2, %v303_v55, %v304_v59  ;;  %2720 = vrot.lane.b32.xlu1 %v2719_v61, %s2845_s21  ;;  %2604 = vmatpush3.bf16.msra.mxu0 %v445_v2 }
  0x2b   :  { %v308_v5 = vsel %vm260_vm2, %v306_v60, %v307_v63  ;;  %2605 = vmatprep.subr.bf16.mxu0 %v2785_v56 }
  0x2c   :  { %2725 = vrot.lane.b32.xlu0 %v2724_v0, %s2846_s24  ;;  %v2729_v6 = vpack.i.bf16 %v308_v5, %v305_v1 }
  0x2e   :  { %2730 = vrot.lane.b32.xlu1 %v2729_v6, %s2846_s24  ;;  %2606 = vmatpush3.bf16.msra.mxu0 %v2785_v56 }
  0x2f   :  { %14 = vsyncpa [#allocation3], 0  ;;  %vm357_vm4 = vcmask 64512   ;;  %vm374_vm5 = vcmask 130048   ;;  %vm418_vm6 = vcmask 195584   ;;  %vm832_vm7 = vcmask 523264  }
  0x30   :  { %vm1457_vm8 = vcmask 517120   ;;  %vm1970_vm9 = vcmask 1041409   ;;  %vm1972_vm10 = vcmask 1042434   ;;  %vm1974_vm11 = vcmask 1043459   ;;  %s2853_s13 = smov [#allocation2]  }
  0x31   :  { %vm2852_vm12 = vmmov 0   ;;  %s2493_s14 = sshll.u32 %s2853_s13, 4  ;;  %s2494_s14 = int_to_ptr.vmem [resolvable:$true] %s2493_s14 }
  0x32   :  { %p2828_p1 = scmp.lt.s32.totalorder %s2494_s14, %s2494_s14 }
  0x7c   :  { %v2656_v7 = vpop.permute.xlu0 %2655 }
  0x7d   :  { %v2658_v8 = vunpack.i.h.bf16 %v2656_v7  ;;  %v2657_v9 = vunpack.i.l.bf16 %v2656_v7  ;;  %v2666_v12 = vpop.permute.xlu1 %2665 }
  0x7e   :  { %v2668_v13 = vunpack.i.h.bf16 %v2666_v12  ;;  %v2667_v14 = vunpack.i.l.bf16 %v2666_v12 }
  0x7f   :  { %v358_v15 = vsel %vm357_vm4, %v2921_v10, %v2657_v9  ;;  %v359_v16 = vsel %vm357_vm4, %v2924_v11, %v2658_v8 }
  0x80   :  { %v375_v17 = vsel %vm374_vm5, %v358_v15, %v2667_v14  ;;  %v376_v18 = vsel %vm374_vm5, %v359_v16, %v2668_v13 }
  0x81   :  { %v2661_v19 = vpop.permute.xlu0 %2660  ;;  %v391_v21 = vpack.c.bf16 %v376_v18, %v375_v17 }
  0x82   :  { %v2663_v22 = vunpack.i.h.bf16 %v2661_v19  ;;  %v2662_v23 = vunpack.i.l.bf16 %v2661_v19  ;;  %v2671_v27 = vpop.permute.xlu1 %2670 }
  0x83   :  { %v2673_v28 = vunpack.i.h.bf16 %v2671_v27  ;;  %v2672_v29 = vunpack.i.l.bf16 %v2671_v27  ;;  %2607 = vmatprep.mubr.msk.bf16.mxu0 %vm418_vm6, %v391_v21 }
  0x84   :  { %v361_v10 = vsel %vm357_vm4, %v2938_v25, %v2663_v22  ;;  %v360_v11 = vsel %vm357_vm4, %v2935_v24, %v2662_v23 }
  0x85   :  { %v377_v30 = vsel %vm374_vm5, %v360_v11, %v2672_v29  ;;  %v378_v31 = vsel %vm374_vm5, %v361_v10, %v2673_v28  ;;  %v2676_v36 = vpop.permute.xlu0 %2675 }
  0x86   :  { %v392_v35 = vpack.c.bf16 %v378_v31, %v377_v30  ;;  %v2678_v37 = vunpack.i.h.bf16 %v2676_v36  ;;  %v2677_v39 = vunpack.i.l.bf16 %v2676_v36 }
  0x88   :  { %2608 = vmatmul.mubr.msk.bf16.vlgmr.msra.gmra.mxu0 %vm418_vm6, %v392_v35  ;;  %v363_v40 = vsel %vm357_vm4, %v2968_v51, %v2678_v37  ;;  %v362_v41 = vsel %vm357_vm4, %v2963_v47, %v2677_v39 }
  0x89   :  { %v2686_v42 = vpop.permute.xlu0 %2685 }
  0x8a   :  { %v2681_v25 = vpop.permute.xlu1 %2680  ;;  %v2688_v46 = vunpack.i.h.bf16 %v2686_v42  ;;  %v2687_v48 = vunpack.i.l.bf16 %v2686_v42  ;;  %v2789_v42 = vld [vmem:[%s3869_s3 + $0x20] sm:$0xff]  }
  0x8b   :  { %v2683_v43 = vunpack.i.h.bf16 %v2681_v25  ;;  %v2682_v24 = vunpack.i.l.bf16 %v2681_v25  ;;  %v2788_v25 = vld [vmem:[%s3869_s3 + $0x28] sm:$0xff]  }
  0x8c   :  { %v379_v49 = vsel %vm374_vm5, %v362_v41, %v2687_v48  ;;  %v380_v50 = vsel %vm374_vm5, %v363_v40, %v2688_v46  ;;  %v2787_v41 = vld [vmem:[%s3869_s3 + $0x30] sm:$0xff]   ;;  %v2792_v46 = vld [vmem:[%s3869_s3 + $0x8] sm:$0xff]   ;;  %v2793_v48 = vld [vmem:[%s3869_s3] sm:$0xff]  }
  0x8d   :  { %v365_v52 = vsel %vm357_vm4, %v2986_v4, %v2683_v43  ;;  %v364_v53 = vsel %vm357_vm4, %v2983_v3, %v2682_v24  ;;  %v393_v51 = vpack.c.bf16 %v380_v50, %v379_v49  ;;  %v2790_v43 = vld [vmem:[%s3869_s3 + $0x18] sm:$0xff]   ;;  %v2791_v24 = vld [vmem:[%s3869_s3 + $0x10] sm:$0xff]  }
  0x8e   :  { %v2691_v54 = vpop.permute.xlu1 %2690  ;;  %v2794_v49 = vld [vmem:[%s3869_s3 + $0x58] sm:$0xff]   ;;  %v2795_v50 = vld [vmem:[%s3869_s3 + $0x50] sm:$0xff]  }
  0x8f   :  { %v2693_v55 = vunpack.i.h.bf16 %v2691_v54  ;;  %v2692_v47 = vunpack.i.l.bf16 %v2691_v54  ;;  %2611 = vmatprep.mubr.msk.bf16.mxu0 %vm418_vm6, %v393_v51 }
  0x90   :  { %v2696_v56 = vpop.permute.xlu0 %2695 }
  0x91   :  { %v381_v57 = vsel %vm374_vm5, %v364_v53, %v2692_v47  ;;  %v382_v58 = vsel %vm374_vm5, %v365_v52, %v2693_v55  ;;  %v2698_v59 = vunpack.i.h.bf16 %v2696_v56  ;;  %v2697_v60 = vunpack.i.l.bf16 %v2696_v56  ;;  %v3192_v52 = vld [vmem:[%s3868_s2] ss:$0 sm:$0xff] }
  0x92   :  { %v394_v61 = vpack.c.bf16 %v382_v58, %v381_v57  ;;  %v2701_v62 = vpop.permute.xlu1 %2700 }
  0x93   :  { %v367_v4 = vsel %vm357_vm4, %v3017_v38, %v2698_v59  ;;  %v366_v3 = vsel %vm357_vm4, %v3011_v34, %v2697_v60  ;;  %v2703_v63 = vunpack.i.h.bf16 %v2701_v62  ;;  %v2702_v0 = vunpack.i.l.bf16 %v2701_v62 }
  0x94   :  { %2612 = vmatmul.mubr.msk.bf16.gmra.mxu0 %vm418_vm6, %v394_v61  ;;  %v2706_v1 = vpop.permute.xlu0 %2705  ;;  %v2796_v61 = vld [vmem:[%s3869_s3 + $0x48] sm:$0xff]  }
  0x95   :  { %v2708_v2 = vunpack.i.h.bf16 %v2706_v1  ;;  %v2707_v5 = vunpack.i.l.bf16 %v2706_v1  ;;  %v369_v6 = vsel %vm357_vm4, %v3026_v45, %v2703_v63  ;;  %v368_v7 = vsel %vm357_vm4, %v3023_v44, %v2702_v0 }
  0x96   :  { %v2711_v9 = vpop.permute.xlu1 %2710 }
  0x97   :  { %v383_v8 = vsel %vm374_vm5, %v366_v3, %v2707_v5  ;;  %v384_v38 = vsel %vm374_vm5, %v367_v4, %v2708_v2  ;;  %v2713_v34 = vunpack.i.h.bf16 %v2711_v9  ;;  %v2712_v13 = vunpack.i.l.bf16 %v2711_v9 }
  0x98   :  { %v395_v12 = vpack.c.bf16 %v384_v38, %v383_v8 }
  0x99   :  { %v385_v14 = vsel %vm374_vm5, %v368_v7, %v2712_v13  ;;  %v386_v15 = vsel %vm374_vm5, %v369_v6, %v2713_v34 }
  0x9a   :  { %v2716_v16 = vpop.permute.xlu0 %2715  ;;  %2615 = vmatprep.mubr.msk.bf16.mxu0 %vm418_vm6, %v395_v12  ;;  %v396_v17 = vpack.c.bf16 %v386_v15, %v385_v14 }
  0x9b   :  { %v2718_v45 = vunpack.i.h.bf16 %v2716_v16  ;;  %v2717_v18 = vunpack.i.l.bf16 %v2716_v16 }
  0x9c   :  { %v2721_v19 = vpop.permute.xlu1 %2720  ;;  %2616 = vmatmul.mubr.msk.bf16.gmra.mxu0 %vm418_vm6, %v396_v17 }
  0x9d   :  { %v371_v44 = vsel %vm357_vm4, %v3065_v26, %v2718_v45  ;;  %v370_v21 = vsel %vm357_vm4, %v3060_v20, %v2717_v18  ;;  %v2723_v22 = vunpack.i.h.bf16 %v2721_v19  ;;  %v2722_v23 = vunpack.i.l.bf16 %v2721_v19 }
  0x9e   :  { %v2726_v27 = vpop.permute.xlu0 %2725 }
  0x9f   :  { %v2728_v28 = vunpack.i.h.bf16 %v2726_v27  ;;  %v2727_v29 = vunpack.i.l.bf16 %v2726_v27  ;;  %v373_v10 = vsel %vm357_vm4, %v3074_v33, %v2723_v22  ;;  %v372_v11 = vsel %vm357_vm4, %v3071_v32, %v2722_v23  ;;  %v2786_v32 = vld [vmem:[%s3869_s3 + $0x38] sm:$0xff]  }
  0xa0   :  { %v2731_v35 = vpop.permute.xlu1 %2730  ;;  %v2847_v33 = vmov 0  }
  0xa1   :  { %v387_v30 = vsel %vm374_vm5, %v370_v21, %v2727_v29  ;;  %v388_v31 = vsel %vm374_vm5, %v371_v44, %v2728_v28  ;;  %v2733_v36 = vunpack.i.h.bf16 %v2731_v35  ;;  %v2732_v37 = vunpack.i.l.bf16 %v2731_v35  ;;  %992 = vmatprep.subr.bf16.mxu1 %v2847_v33 }
  0xa2   :  { %v397_v26 = vpack.c.bf16 %v388_v31, %v387_v30  ;;  %993 = vmatpush1.bf16.msra.mxu1 %v2786_v32 }
  0xa3   :  { %v389_v20 = vsel %vm374_vm5, %v372_v11, %v2732_v37  ;;  %v390_v39 = vsel %vm374_vm5, %v373_v10, %v2733_v36  ;;  %994 = vmatprep.subr.bf16.mxu1 %v2847_v33  ;;  %v2797_v36 = vld [vmem:[%s3869_s3 + $0x40] sm:$0xff]   ;;  %s2848_s3 = smov 64  }
  0xa4   :  { %2619 = vmatprep.mubr.msk.bf16.mxu0 %vm418_vm6, %v397_v26  ;;  %v398_v40 = vpack.c.bf16 %v390_v39, %v389_v20 }
  0xa6   :  { %2620 = vmatmul.mubr.msk.bf16.gmra.mxu0 %vm418_vm6, %v398_v40  ;;  %995 = vmatpush1.bf16.msra.mxu1 %v2787_v41 }
  0xa7   :  { %996 = vmatprep.subr.bf16.mxu1 %v2847_v33 }
  0xaa   :  { %997 = vmatpush1.bf16.msra.mxu1 %v2788_v25 }
  0xab   :  { %998 = vmatprep.subr.bf16.mxu1 %v2847_v33 }
  0xae   :  { %999 = vmatpush1.bf16.msra.mxu1 %v2789_v42 }
  0xaf   :  { %1000 = vmatprep.subr.bf16.mxu1 %v2847_v33 }
  0xb2   :  { %1001 = vmatpush1.bf16.msra.mxu1 %v2790_v43 }
  0xb3   :  { %1002 = vmatprep.subr.bf16.mxu1 %v2847_v33 }
  0xb6   :  { %1003 = vmatpush1.bf16.msra.mxu1 %v2791_v24 }
  0xb7   :  { %1004 = vmatprep.subr.bf16.mxu1 %v2847_v33 }
  0xba   :  { %1005 = vmatpush1.bf16.msra.mxu1 %v2792_v46 }
  0xbb   :  { %1006 = vmatprep.subr.bf16.mxu1 %v2847_v33 }
  0xbe   :  { %1007 = vmatpush1.bf16.msra.mxu1 %v2793_v48 }
  0xbf   :  { %1016 = vmatprep.subr.bf16.mxu1 %v2847_v33 }
  0xc2   :  { %1017 = vmatpush2.bf16.msra.mxu1 %v2794_v49 }
  0xc3   :  { %1018 = vmatprep.subr.bf16.mxu1 %v2847_v33 }
  0xc6   :  { %1019 = vmatpush2.bf16.msra.mxu1 %v2795_v50 }
  0xc7   :  { %1020 = vmatprep.subr.bf16.mxu1 %v2847_v33 }
  0xca   :  { %1021 = vmatpush2.bf16.msra.mxu1 %v2796_v61 }
  0xcb   :  { %1022 = vmatprep.subr.bf16.mxu1 %v2847_v33 }
  0xce   :  { %1023 = vmatpush2.bf16.msra.mxu1 %v2797_v36 }
 0x148   :  { %v2609_v53 = vpop.f32.mrf.mxu0 }
 0x149   :  { %v490_v51 = vadd.f32 %v2609_v53, %v3192_v52 }
 0x14a   :  { %v481_v54 = vpop.f32.mrf.mxu0 }
 0x14b   :  { %v546_v55 = vmax.f32 %v490_v51, 0.0  ;;  %v482_v47 = vadd.f32 %v3192_v52, %v481_v54 }
 0x14c   :  { %v2610_v56 = vpop.f32.mrf.mxu0 }
 0x14d   :  { %v578_v57 = vrot.slane %v546_v55, 7  ;;  %v544_v58 = vmax.f32 %v482_v47, 0.0  ;;  %v493_v59 = vadd.f32 %v2610_v56, %v3192_v52 }
 0x14e   :  { %v484_v60 = vpop.f32.mrf.mxu0 }
 0x14f   :  { %v3201_v62 = vsel %vm98_vm0, 0.0, %v578_v57  ;;  %v626_v4 = vsel %vm98_vm0, %v578_v57, 0.0  ;;  %v576_v3 = vrot.slane %v544_v58, 7  ;;  %v547_v63 = vmax.f32 %v493_v59, 0.0 }
 0x150   :  { %v678_v0 = vrot.slane %v3201_v62, 1  ;;  %v679_v1 = vrot.slane %v626_v4, 1  ;;  %v485_v7 = vadd.f32 %v3192_v52, %v484_v60  ;;  %v774_v8 = vrot.slane %v3201_v62, 2 }
 0x151   :  { %v3206_v2 = vsel %vm98_vm0, 0.0, %v576_v3  ;;  %v624_v5 = vsel %vm98_vm0, %v576_v3, 0.0  ;;  %v579_v6 = vrot.slane %v547_v63, 7  ;;  %v775_v38 = vrot.slane %v626_v4, 2 }
 0x152   :  { %v768_v9 = vrot.slane %v3206_v2, 2  ;;  %v769_v12 = vrot.slane %v624_v5, 2  ;;  %v672_v34 = vrot.slane %v3206_v2, 1  ;;  %v545_v15 = vmax.f32 %v485_v7, 0.0 }
 0x153   :  { %v3214_v13 = vsel %vm98_vm0, 0.0, %v579_v6  ;;  %v627_v14 = vsel %vm98_vm0, %v579_v6, 0.0  ;;  %v673_v44 = vrot.slane %v624_v5, 1  ;;  %v680_v23 = vsel %vm163_vm1, %v678_v0, %v679_v1 }
 0x154   :  { %v681_v16 = vrot.slane %v3214_v13, 1  ;;  %v682_v17 = vrot.slane %v627_v14, 1  ;;  %v777_v45 = vrot.slane %v3214_v13, 2  ;;  %v778_v18 = vrot.slane %v627_v14, 2  ;;  %v2613_v19 = vpop.f32.mrf.mxu0 }
 0x155   :  { %v577_v21 = vrot.slane %v545_v15, 7  ;;  %v506_v22 = vadd.f32 %v2613_v19, %v3192_v52  ;;  %v3223_v29 = vsel %vm260_vm2, %v768_v9, %v769_v12  ;;  %v3226_v10 = vsel %vm260_vm2, %v774_v8, %v775_v38 }
 0x156   :  { %v497_v27 = vpop.f32.mrf.mxu0  ;;  %v683_v28 = vsel %vm163_vm1, %v681_v16, %v682_v17  ;;  %v3229_v11 = vsel %vm260_vm2, %v777_v45, %v778_v18  ;;  %v674_v46 = vsel %vm163_vm1, %v672_v34, %v673_v44 }
 0x157   :  { %v3232_v30 = vsel %vm98_vm0, 0.0, %v577_v21  ;;  %v625_v31 = vsel %vm98_vm0, %v577_v21, 0.0  ;;  %v550_v35 = vmax.f32 %v506_v22, 0.0  ;;  %v498_v26 = vadd.f32 %v3192_v52, %v497_v27 }
 0x158   :  { %v675_v37 = vrot.slane %v3232_v30, 1  ;;  %v676_v20 = vrot.slane %v625_v31, 1  ;;  %v771_v39 = vrot.slane %v3232_v30, 2  ;;  %v772_v40 = vrot.slane %v625_v31, 2  ;;  %v2614_v32 = vpop.f32.mrf.mxu0 }
 0x159   :  { %v582_v33 = vrot.slane %v550_v35, 7  ;;  %v548_v41 = vmax.f32 %v498_v26, 0.0  ;;  %v509_v25 = vadd.f32 %v2614_v32, %v3192_v52  ;;  %v2739_v42 = vpack.i.bf16 %v683_v28, %v680_v23 }
 0x15a   :  { %v500_v43 = vpop.f32.mrf.mxu0  ;;  %v773_v24 = vsel %vm260_vm2, %v771_v39, %v772_v40  ;;  %v677_v48 = vsel %vm163_vm1, %v675_v37, %v676_v20 }
 0x15b   :  { %v3248_v50 = vsel %vm98_vm0, 0.0, %v582_v33  ;;  %v3251_v53 = vsel %vm98_vm0, %v582_v33, 0.0  ;;  %v580_v51 = vrot.slane %v548_v41, 7  ;;  %v551_v54 = vmax.f32 %v509_v25, 0.0  ;;  %2740 = vrot.lane.b32.xlu1 %v2739_v42, %s2848_s3 }
 0x15c   :  { %v690_v55 = vrot.slane %v3248_v50, 1  ;;  %v691_v47 = vrot.slane %v3251_v53, 1  ;;  %v786_v56 = vrot.slane %v3248_v50, 2  ;;  %v787_v57 = vrot.slane %v3251_v53, 2  ;;  %v2617_v4 = vpop.f32.mrf.mxu0 }
 0x15d   :  { %v3259_v58 = vsel %vm98_vm0, 0.0, %v580_v51  ;;  %v3262_v59 = vsel %vm98_vm0, %v580_v51, 0.0  ;;  %v583_v60 = vrot.slane %v551_v54, 7  ;;  %v501_v61 = vadd.f32 %v3192_v52, %v500_v43 }
 0x15e   :  { %v684_v3 = vrot.slane %v3259_v58, 1  ;;  %v685_v63 = vrot.slane %v3262_v59, 1  ;;  %v780_v0 = vrot.slane %v3259_v58, 2  ;;  %v781_v1 = vrot.slane %v3262_v59, 2  ;;  %v513_v38 = vpop.f32.mrf.mxu0 }
 0x15f   :  { %v3270_v5 = vsel %vm98_vm0, 0.0, %v583_v60  ;;  %v3273_v6 = vsel %vm98_vm0, %v583_v60, 0.0  ;;  %v549_v7 = vmax.f32 %v501_v61, 0.0  ;;  %v522_v8 = vadd.f32 %v2617_v4, %v3192_v52 }
 0x160   :  { %v693_v9 = vrot.slane %v3270_v5, 1  ;;  %v694_v12 = vrot.slane %v3273_v6, 1  ;;  %v789_v34 = vrot.slane %v3270_v5, 2  ;;  %v790_v14 = vrot.slane %v3273_v6, 2  ;;  %v2618_v18 = vpop.f32.mrf.mxu0 }
 0x161   :  { %v581_v15 = vrot.slane %v549_v7, 7  ;;  %v554_v16 = vmax.f32 %v522_v8, 0.0  ;;  %v514_v17 = vadd.f32 %v3192_v52, %v513_v38  ;;  %v850_v45 = vpack.c.bf16 %v773_v24, %v3223_v29 }
 0x162   :  { %v2734_v19 = vpack.i.bf16 %v677_v48, %v674_v46  ;;  %v525_v44 = vadd.f32 %v2618_v18, %v3192_v52  ;;  %v692_v21 = vsel %vm163_vm1, %v690_v55, %v691_v47  ;;  %v695_v22 = vsel %vm163_vm1, %v693_v9, %v694_v12  ;;  %v516_v35 = vpop.f32.mrf.mxu0 }
 0x163   :  { %v3286_v23 = vsel %vm98_vm0, 0.0, %v581_v15  ;;  %v3289_v27 = vsel %vm98_vm0, %v581_v15, 0.0  ;;  %v586_v28 = vrot.slane %v554_v16, 7  ;;  %v552_v31 = vmax.f32 %v514_v17, 0.0  ;;  %2528 = vmatprep.mubr.msk.bf16.mxu1 %vm832_vm7, %v850_v45 }
 0x164   :  { %v687_v29 = vrot.slane %v3286_v23, 1  ;;  %v688_v26 = vrot.slane %v3289_v27, 1  ;;  %v783_v36 = vrot.slane %v3286_v23, 2  ;;  %v784_v37 = vrot.slane %v3289_v27, 2  ;;  %2735 = vrot.lane.b32.xlu0 %v2734_v19, %s2848_s3 }
 0x165   :  { %v3298_v20 = vsel %vm98_vm0, 0.0, %v586_v28  ;;  %v3301_v39 = vsel %vm98_vm0, %v586_v28, 0.0  ;;  %v584_v40 = vrot.slane %v552_v31, 7  ;;  %v555_v32 = vmax.f32 %v525_v44, 0.0 }
 0x166   :  { %v702_v33 = vrot.slane %v3298_v20, 1  ;;  %v703_v41 = vrot.slane %v3301_v39, 1  ;;  %v517_v48 = vadd.f32 %v3192_v52, %v516_v35  ;;  %v2621_v51 = vpop.f32.mrf.mxu0  ;;  %v2749_v18 = vpack.i.bf16 %v695_v22, %v692_v21 }
 0x167   :  { %v3308_v43 = vsel %vm98_vm0, 0.0, %v584_v40  ;;  %v3311_v24 = vsel %vm98_vm0, %v584_v40, 0.0  ;;  %v587_v46 = vrot.slane %v555_v32, 7  ;;  %v538_v8 = vadd.f32 %v2621_v51, %v3192_v52 }
 0x168   :  { %v696_v54 = vrot.slane %v3308_v43, 1  ;;  %v697_v55 = vrot.slane %v3311_v24, 1  ;;  %v792_v47 = vrot.slane %v3308_v43, 2  ;;  %v793_v60 = vrot.slane %v3311_v24, 2  ;;  %v529_v38 = vpop.f32.mrf.mxu0  ;;  %2750 = vrot.lane.b32.xlu1 %v2749_v18, %s2848_s3 }
 0x169   :  { %v3319_v61 = vsel %vm98_vm0, 0.0, %v587_v46  ;;  %v3322_v4 = vsel %vm98_vm0, %v587_v46, 0.0  ;;  %v553_v7 = vmax.f32 %v517_v48, 0.0  ;;  %v558_v45 = vmax.f32 %v538_v8, 0.0 }
 0x16a   :  { %v705_v9 = vrot.slane %v3319_v61, 1  ;;  %v706_v12 = vrot.slane %v3322_v4, 1  ;;  %v530_v19 = vadd.f32 %v3192_v52, %v529_v38  ;;  %v2622_v44 = vpop.f32.mrf.mxu0  ;;  %v686_v28 = vsel %vm163_vm1, %v684_v3, %v685_v63 }
 0x16b   :  { %v585_v17 = vrot.slane %v553_v7, 7  ;;  %v689_v31 = vsel %vm163_vm1, %v687_v29, %v688_v26  ;;  %v541_v35 = vadd.f32 %v2622_v44, %v3192_v52  ;;  %v704_v40 = vsel %vm163_vm1, %v702_v33, %v703_v41 }
 0x16c   :  { %v590_v22 = vrot.slane %v558_v45, 7  ;;  %v556_v46 = vmax.f32 %v530_v19, 0.0  ;;  %v532_v26 = vpop.f32.mrf.mxu0  ;;  %v2744_v7 = vpack.i.bf16 %v689_v31, %v686_v28  ;;  %v698_v16 = vsel %vm163_vm1, %v696_v54, %v697_v55 }
 0x16d   :  { %v3339_v32 = vsel %vm98_vm0, 0.0, %v585_v17  ;;  %v3342_v21 = vsel %vm98_vm0, %v585_v17, 0.0  ;;  %v559_v44 = vmax.f32 %v541_v35, 0.0  ;;  %v788_v59 = vsel %vm260_vm2, %v786_v56, %v787_v57 }
 0x16e   :  { %v699_v48 = vrot.slane %v3339_v32, 1  ;;  %v700_v3 = vrot.slane %v3342_v21, 1  ;;  %v795_v63 = vrot.slane %v3339_v32, 2  ;;  %v796_v29 = vrot.slane %v3342_v21, 2  ;;  %2745 = vrot.lane.b32.xlu0 %v2744_v7, %s2848_s3 }
 0x16f   :  { %v3350_v33 = vsel %vm98_vm0, 0.0, %v590_v22  ;;  %v3353_v41 = vsel %vm98_vm0, %v590_v22, 0.0  ;;  %v588_v51 = vrot.slane %v556_v46, 7  ;;  %v533_v21 = vadd.f32 %v3192_v52, %v532_v26 }
 0x170   :  { %v714_v8 = vrot.slane %v3350_v33, 1  ;;  %v715_v38 = vrot.slane %v3353_v41, 1  ;;  %v810_v17 = vrot.slane %v3350_v33, 2  ;;  %v811_v45 = vrot.slane %v3353_v41, 2 }
 0x171   :  { %v3360_v18 = vsel %vm98_vm0, 0.0, %v588_v51  ;;  %v636_v19 = vsel %vm98_vm0, %v588_v51, 0.0  ;;  %v591_v49 = vrot.slane %v559_v44, 7  ;;  %v557_v15 = vmax.f32 %v533_v21, 0.0 }
 0x172   :  { %v708_v28 = vrot.slane %v3360_v18, 1  ;;  %v709_v31 = vrot.slane %v636_v19, 1  ;;  %v804_v22 = vrot.slane %v3360_v18, 2  ;;  %v805_v46 = vrot.slane %v636_v19, 2 }
 0x173   :  { %v707_v41 = vsel %vm163_vm1, %v705_v9, %v706_v12  ;;  %v701_v51 = vsel %vm163_vm1, %v699_v48, %v700_v3  ;;  %v716_v7 = vsel %vm163_vm1, %v714_v8, %v715_v38  ;;  %v3373_v52 = vsel %vm98_vm0, 0.0, %v591_v49 }
 0x174   :  { %v2759_v25 = vpack.i.bf16 %v707_v41, %v704_v40  ;;  %v710_v35 = vsel %vm163_vm1, %v708_v28, %v709_v31  ;;  %v639_v26 = vsel %vm98_vm0, %v591_v49, 0.0  ;;  %v589_v42 = vrot.slane %v557_v15, 7 }
 0x175   :  { %v2754_v19 = vpack.i.bf16 %v701_v51, %v698_v16  ;;  %v717_v44 = vrot.slane %v3373_v52, 1  ;;  %v718_v21 = vrot.slane %v639_v26, 1  ;;  %v813_v9 = vrot.slane %v3373_v52, 2 }
 0x176   :  { %v814_v54 = vrot.slane %v639_v26, 2  ;;  %2760 = vrot.lane.b32.xlu1 %v2759_v25, %s2848_s3  ;;  %v3380_v55 = vsel %vm98_vm0, 0.0, %v589_v42  ;;  %v637_v12 = vsel %vm98_vm0, %v589_v42, 0.0  ;;  %v782_v49 = vsel %vm260_vm2, %v780_v0, %v781_v1 }
 0x177   :  { %2755 = vrot.lane.b32.xlu0 %v2754_v19, %s2848_s3  ;;  %v785_v15 = vsel %vm260_vm2, %v783_v36, %v784_v37  ;;  %v711_v25 = vrot.slane %v3380_v55, 1  ;;  %v712_v16 = vrot.slane %v637_v12, 1  ;;  %v807_v40 = vrot.slane %v3380_v55, 2 }
 0x178   :  { %v808_v42 = vrot.slane %v637_v12, 2  ;;  %v719_v48 = vsel %vm163_vm1, %v717_v44, %v718_v21  ;;  %v854_v3 = vpack.c.bf16 %v785_v15, %v782_v49  ;;  %v791_v0 = vsel %vm260_vm2, %v789_v34, %v790_v14 }
 0x179   :  { %v2769_v1 = vpack.i.bf16 %v719_v48, %v716_v7  ;;  %v713_v27 = vsel %vm163_vm1, %v711_v25, %v712_v16  ;;  %v856_v36 = vpack.c.bf16 %v791_v0, %v788_v59  ;;  %v794_v53 = vsel %vm260_vm2, %v792_v47, %v793_v60 }
 0x17a   :  { %v2764_v37 = vpack.i.bf16 %v713_v27, %v710_v35  ;;  %v797_v8 = vsel %vm260_vm2, %v795_v63, %v796_v29  ;;  %v3876_v56 = vrot.slane %v3301_v39, 2  ;;  %v3877_v57 = vrot.slane %v3298_v20, 2 }
 0x17b   :  { %v3878_v34 = vrot.slane %v3322_v4, 2  ;;  %v3879_v14 = vrot.slane %v3319_v61, 2  ;;  %2770 = vrot.lane.b32.xlu1 %v2769_v1, %s2848_s3  ;;  %v858_v24 = vpack.c.bf16 %v797_v8, %v794_v53  ;;  %v806_v47 = vsel %vm260_vm2, %v804_v22, %v805_v46 }
 0x17c   :  { %v800_v6 = vsel %vm260_vm2, %v3877_v57, %v3876_v56  ;;  %v809_v60 = vsel %vm260_vm2, %v807_v40, %v808_v42  ;;  %2765 = vrot.lane.b32.xlu0 %v2764_v37, %s2848_s3  ;;  %v812_v63 = vsel %vm260_vm2, %v810_v17, %v811_v45  ;;  %v815_v29 = vsel %vm260_vm2, %v813_v9, %v814_v54 }
 0x17d   :  { %v803_v38 = vsel %vm260_vm2, %v3879_v14, %v3878_v34  ;;  %v862_v39 = vpack.c.bf16 %v809_v60, %v806_v47  ;;  %v864_v4 = vpack.c.bf16 %v815_v29, %v812_v63  ;;  %v3880_v17 = vpack.c.bf16 %v3229_v11, %v3226_v10 }
 0x17e   :  { %v860_v28 = vpack.c.bf16 %v803_v38, %v800_v6  ;;  %v2849_v34 = vmov 1983009808   ;;  %v1125_v14 = vlaneseq }
 0x1cd   :  { %v2741_v7 = vpop.permute.xlu1 %2740 }
 0x1ce   :  { %v2743_v26 = vunpack.i.h.bf16 %v2741_v7  ;;  %v2742_v19 = vunpack.i.l.bf16 %v2741_v7 }
 0x1d0   :  { %v835_v45 = vsel %vm832_vm7, %v3201_v62, %v2742_v19  ;;  %v836_v44 = vsel %vm832_vm7, %v3214_v13, %v2743_v26 }
 0x1d1   :  { %v851_v21 = vpack.c.bf16 %v836_v44, %v835_v45 }
 0x1d6   :  { %v2736_v31 = vpop.permute.xlu0 %2735 }
 0x1d7   :  { %v2738_v41 = vunpack.i.h.bf16 %v2736_v31  ;;  %v2737_v51 = vunpack.i.l.bf16 %v2736_v31 }
 0x1d9   :  { %v833_v35 = vsel %vm832_vm7, %v3206_v2, %v2737_v51  ;;  %v834_v22 = vsel %vm832_vm7, %v3232_v30, %v2738_v41 }
 0x1da   :  { %v849_v46 = vpack.c.bf16 %v834_v22, %v833_v35  ;;  %v2751_v11 = vpop.permute.xlu1 %2750 }
 0x1db   :  { %v2753_v49 = vunpack.i.h.bf16 %v2751_v11  ;;  %v2752_v62 = vunpack.i.l.bf16 %v2751_v11 }
 0x1dc   :  { %1025 = vmatmul.mubr.bf16.vlgmr.msra.gmra.mxu1 %v849_v46 }
 0x1dd   :  { %2529 = vmatprep.mubr.msk.bf16.mxu1 %vm832_vm7, %v3880_v17  ;;  %v839_v13 = vsel %vm832_vm7, %v3248_v50, %v2752_v62  ;;  %v840_v15 = vsel %vm832_vm7, %v3270_v5, %v2753_v49 }
 0x1de   :  { %v855_v16 = vpack.c.bf16 %v840_v15, %v839_v13 }
 0x1e0   :  { %v2746_v2 = vpop.permute.xlu0 %2745 }
 0x1e1   :  { %v2748_v9 = vunpack.i.h.bf16 %v2746_v2  ;;  %v2747_v54 = vunpack.i.l.bf16 %v2746_v2 }
 0x1e3   :  { %v837_v30 = vsel %vm832_vm7, %v3259_v58, %v2747_v54  ;;  %v838_v10 = vsel %vm832_vm7, %v3286_v23, %v2748_v9 }
 0x1e4   :  { %1033 = vmatmul.mubr.bf16.gmra.mxu1 %v851_v21  ;;  %v853_v12 = vpack.c.bf16 %v838_v10, %v837_v30 }
 0x1e5   :  { %2530 = vmatprep.mubr.msk.bf16.mxu1 %vm832_vm7, %v854_v3 }
 0x1e8   :  { %v2761_v48 = vpop.permute.xlu1 %2760 }
 0x1e9   :  { %v2756_v25 = vpop.permute.xlu0 %2755  ;;  %v2763_v59 = vunpack.i.h.bf16 %v2761_v48  ;;  %v2762_v50 = vunpack.i.l.bf16 %v2761_v48 }
 0x1ea   :  { %v2758_v40 = vunpack.i.h.bf16 %v2756_v25  ;;  %v2757_v58 = vunpack.i.l.bf16 %v2756_v25 }
 0x1eb   :  { %v843_v5 = vsel %vm832_vm7, %v3298_v20, %v2762_v50  ;;  %v844_v0 = vsel %vm832_vm7, %v3319_v61, %v2763_v59 }
 0x1ec   :  { %1041 = vmatmul.mubr.bf16.gmra.mxu1 %v853_v12  ;;  %v841_v23 = vsel %vm832_vm7, %v3308_v43, %v2757_v58  ;;  %v842_v42 = vsel %vm832_vm7, %v3339_v32, %v2758_v40  ;;  %v859_v27 = vpack.c.bf16 %v844_v0, %v843_v5 }
 0x1ed   :  { %2531 = vmatprep.mubr.msk.bf16.mxu1 %vm832_vm7, %v856_v36  ;;  %v857_v3 = vpack.c.bf16 %v842_v42, %v841_v23  ;;  %v2771_v37 = vpop.permute.xlu1 %2770 }
 0x1ee   :  { %v2766_v1 = vpop.permute.xlu0 %2765  ;;  %v2773_v56 = vunpack.i.h.bf16 %v2771_v37  ;;  %v2772_v20 = vunpack.i.l.bf16 %v2771_v37 }
 0x1ef   :  { %v2768_v36 = vunpack.i.h.bf16 %v2766_v1  ;;  %v2767_v43 = vunpack.i.l.bf16 %v2766_v1 }
 0x1f0   :  { %v847_v61 = vsel %vm832_vm7, %v3350_v33, %v2772_v20  ;;  %v848_v57 = vsel %vm832_vm7, %v3373_v52, %v2773_v56 }
 0x1f1   :  { %v845_v32 = vsel %vm832_vm7, %v3360_v18, %v2767_v43  ;;  %v846_v53 = vsel %vm832_vm7, %v3380_v55, %v2768_v36  ;;  %v863_v6 = vpack.c.bf16 %v848_v57, %v847_v61  ;;  %v1123_v18 = vunpack.c.l.s4 %v2849_v34 }
 0x1f2   :  { %v861_v8 = vpack.c.bf16 %v846_v53, %v845_v32  ;;  %v3472_v55 = vshrl.u32 %v1125_v14, 7 }
 0x1f3   :  { %v1124_v38 = vunpack.c.0.s8 %v1123_v18 }
 0x1f4   :  { %1049 = vmatmul.mubr.bf16.gmra.mxu1 %v855_v16 }
 0x1f5   :  { %2532 = vmatprep.mubr.msk.bf16.mxu1 %vm832_vm7, %v858_v24  ;;  %v3477_v24 = vld [vmem:[%s3870_s4] ss:$0 sm:$0xff]  ;;  %v3481_v33 = vsub.s32 %v1124_v38, %v3472_v55 }
 0x1fc   :  { %1057 = vmatmul.mubr.bf16.gmra.mxu1 %v857_v3 }
 0x1fd   :  { %2533 = vmatprep.mubr.msk.bf16.mxu1 %vm832_vm7, %v860_v28 }
 0x204   :  { %1065 = vmatmul.mubr.bf16.gmra.mxu1 %v859_v27 }
 0x205   :  { %2534 = vmatprep.mubr.msk.bf16.mxu1 %vm832_vm7, %v862_v39 }
 0x20c   :  { %1073 = vmatmul.mubr.bf16.gmra.mxu1 %v861_v8 }
 0x20d   :  { %2535 = vmatprep.mubr.msk.bf16.mxu1 %vm832_vm7, %v864_v4 }
 0x214   :  { %1081 = vmatmul.mubr.bf16.gmra.mxu1 %v863_v6 }
 0x29c   :  { %v1026_v28 = vpop.f32.mrf.mxu1 }
 0x29d   :  { %v1027_v47 = vadd.f32 %v3477_v24, %v1026_v28 }
 0x29e   :  { %v1028_v52 = vpop.f32.mrf.mxu1 }
 0x29f   :  { %v1089_v60 = vmax.f32 %v1027_v47, 0.0 }
 0x2a0   :  { %v1029_v39 = vpop.f32.mrf.mxu1 }
 0x2a1   :  { %v1121_v63 = vcombine.high %v1089_v60, %v1089_v60  ;;  %v1128_v29 = vrot.slane %v1089_v60, %v3481_v33  ;;  %v1030_v4 = vadd.f32 %v3477_v24, %v1029_v39 }
 0x2a2   :  { %v1031_v31 = vpop.f32.mrf.mxu1 }
 0x2a3   :  { %v1135_v41 = vrot.slane %v1121_v63, %v3481_v33  ;;  %v1136_v51 = vcombine.high %v1128_v29, %v1128_v29  ;;  %v1458_v7 = vsel %vm1457_vm8, %v1128_v29, -inf  ;;  %v1090_v35 = vmax.f32 %v1030_v4, 0.0 }
 0x2a4   :  { %v1459_v22 = vrot.slane %v1458_v7, 4  ;;  %v1034_v46 = vpop.f32.mrf.mxu1 }
 0x2a5   :  { %v1137_v26 = vcombine.high %v1135_v41, %v1135_v41  ;;  %v1465_v19 = vsel %vm1457_vm8, %v1136_v51, -inf  ;;  %v1472_v17 = vsel %vm1457_vm8, %v1135_v41, -inf  ;;  %v1138_v45 = vcombine.high %v1090_v35, %v1090_v35 }
 0x2a6   :  { %v1460_v44 = vmax.f32 %v1458_v7, %v1459_v22  ;;  %v1466_v21 = vrot.slane %v1465_v19, 4  ;;  %v1473_v2 = vrot.slane %v1472_v17, 4  ;;  %v1145_v9 = vrot.slane %v1090_v35, %v3481_v33  ;;  %v1036_v54 = vpop.f32.mrf.mxu1 }
 0x2a7   :  { %v1479_v30 = vsel %vm1457_vm8, %v1137_v26, -inf  ;;  %v1152_v10 = vrot.slane %v1138_v45, %v3481_v33  ;;  %v1035_v11 = vadd.f32 %v3477_v24, %v1034_v46 }
 0x2a8   :  { %v1461_v12 = vrot.slane %v1460_v44, 2  ;;  %v1467_v49 = vmax.f32 %v1465_v19, %v1466_v21  ;;  %v1474_v62 = vmax.f32 %v1472_v17, %v1473_v2  ;;  %v1480_v13 = vrot.slane %v1479_v30, 4  ;;  %v3493_v15 = vpop.f32.mrf.mxu1 }
 0x2a9   :  { %v1153_v25 = vcombine.high %v1145_v9, %v1145_v9  ;;  %v1154_v16 = vcombine.high %v1152_v10, %v1152_v10  ;;  %v1486_v40 = vsel %vm1457_vm8, %v1145_v9, -inf  ;;  %v1500_v58 = vsel %vm1457_vm8, %v1152_v10, -inf }
 0x2aa   :  { %v1462_v23 = vmax.f32 %v1460_v44, %v1461_v12  ;;  %v1468_v42 = vrot.slane %v1467_v49, 2  ;;  %v1475_v48 = vrot.slane %v1474_v62, 2  ;;  %v1481_v3 = vmax.f32 %v1479_v30, %v1480_v13  ;;  %v1039_v59 = vpop.f32.mrf.mxu1 }
 0x2ab   :  { %v1487_v50 = vrot.slane %v1486_v40, 4  ;;  %v1493_v5 = vsel %vm1457_vm8, %v1153_v25, -inf  ;;  %v1501_v0 = vrot.slane %v1500_v58, 4  ;;  %v1507_v1 = vsel %vm1457_vm8, %v1154_v16, -inf }
 0x2ac   :  { %v1463_v27 = vrot.slane %v1462_v23, 1  ;;  %v1469_v36 = vmax.f32 %v1467_v49, %v1468_v42  ;;  %v1476_v43 = vmax.f32 %v1474_v62, %v1475_v48  ;;  %v1482_v32 = vrot.slane %v1481_v3, 2  ;;  %v1042_v53 = vpop.f32.mrf.mxu1 }
 0x2ad   :  { %v1488_v37 = vmax.f32 %v1486_v40, %v1487_v50  ;;  %v1494_v8 = vrot.slane %v1493_v5, 4  ;;  %v1502_v56 = vmax.f32 %v1500_v58, %v1501_v0  ;;  %v1508_v20 = vrot.slane %v1507_v1, 4 }
 0x2ae   :  { %v1464_v61 = vmax.f32 %v1462_v23, %v1463_v27  ;;  %v1470_v57 = vrot.slane %v1469_v36, 1  ;;  %v1477_v6 = vrot.slane %v1476_v43, 1  ;;  %v1483_v34 = vmax.f32 %v1481_v3, %v1482_v32  ;;  %v1044_v18 = vpop.f32.mrf.mxu1 }
 0x2af   :  { %v1489_v14 = vrot.slane %v1488_v37, 2  ;;  %v1495_v38 = vmax.f32 %v1493_v5, %v1494_v8  ;;  %v1503_v28 = vrot.slane %v1502_v56, 2  ;;  %v1509_v47 = vmax.f32 %v1507_v1, %v1508_v20 }
 0x2b0   :  { %v1471_v52 = vmax.f32 %v1469_v36, %v1470_v57  ;;  %v1478_v60 = vmax.f32 %v1476_v43, %v1477_v6  ;;  %v1484_v39 = vrot.slane %v1483_v34, 1  ;;  %v1091_v63 = vmax.f32 %v1035_v11, 0.0  ;;  %v1045_v29 = vpop.f32.mrf.mxu1 }
 0x2b1   :  { %v1490_v4 = vmax.f32 %v1488_v37, %v1489_v14  ;;  %v1496_v31 = vrot.slane %v1495_v38, 2  ;;  %v1504_v41 = vmax.f32 %v1502_v56, %v1503_v28  ;;  %v1510_v51 = vrot.slane %v1509_v47, 2 }
 0x2b2   :  { %v3499_v7 = vmax.f32 %v1483_v34, %v1484_v39  ;;  %v1971_v35 = vsel %vm1970_vm9, %v1471_v52, %v1464_v61  ;;  %v1155_v22 = vcombine.high %v1091_v63, %v1091_v63  ;;  %v1162_v46 = vrot.slane %v1091_v63, %v3481_v33  ;;  %v1047_v26 = vpop.f32.mrf.mxu1 }
 0x2b3   :  { %v3504_v19 = vsel %vm1972_vm10, %v1478_v60, %v1971_v35  ;;  %v1491_v17 = vrot.slane %v1490_v4, 1  ;;  %v1497_v45 = vmax.f32 %v1495_v38, %v1496_v31  ;;  %v1505_v44 = vrot.slane %v1504_v41, 1 }
 0x2b4   :  { %v1511_v21 = vmax.f32 %v1509_v47, %v1510_v51  ;;  %v1169_v2 = vrot.slane %v1155_v22, %v3481_v33  ;;  %v1170_v9 = vcombine.high %v1162_v46, %v1162_v46  ;;  %v1514_v54 = vsel %vm1457_vm8, %v1162_v46, -inf  ;;  %v3508_v30 = vpop.f32.mrf.mxu1 }
 0x2b5   :  { %v1492_v10 = vmax.f32 %v1490_v4, %v1491_v17  ;;  %v1498_v11 = vrot.slane %v1497_v45, 1  ;;  %v1506_v12 = vmax.f32 %v1504_v41, %v1505_v44  ;;  %v1515_v49 = vrot.slane %v1514_v54, 4 }
 0x2b6   :  { %v1512_v62 = vrot.slane %v1511_v21, 1  ;;  %v1171_v13 = vcombine.high %v1169_v2, %v1169_v2  ;;  %v1521_v25 = vsel %vm1457_vm8, %v1170_v9, -inf  ;;  %v1528_v16 = vsel %vm1457_vm8, %v1169_v2, -inf  ;;  %v1052_v40 = vpop.f32.mrf.mxu1 }
 0x2b7   :  { %v1499_v58 = vmax.f32 %v1497_v45, %v1498_v11  ;;  %v1516_v23 = vmax.f32 %v1514_v54, %v1515_v49  ;;  %v1522_v42 = vrot.slane %v1521_v25, 4  ;;  %v1529_v48 = vrot.slane %v1528_v16, 4 }
 0x2b8   :  { %v3512_v3 = vmax.f32 %v1511_v21, %v1512_v62  ;;  %v1535_v59 = vsel %vm1457_vm8, %v1171_v13, -inf  ;;  %v1038_v50 = vadd.f32 %v3477_v24, %v3493_v15  ;;  %v1043_v5 = vadd.f32 %v3477_v24, %v1042_v53  ;;  %v3518_v0 = vpop.f32.mrf.mxu1 }
 0x2b9   :  { %v1976_v1 = vsel %vm1970_vm9, %v1499_v58, %v1492_v10  ;;  %v1517_v27 = vrot.slane %v1516_v23, 2  ;;  %v1523_v36 = vmax.f32 %v1521_v25, %v1522_v42  ;;  %v1530_v43 = vmax.f32 %v1528_v16, %v1529_v48 }
 0x2ba   :  { %v3522_v32 = vsel %vm1972_vm10, %v1506_v12, %v1976_v1  ;;  %v1536_v37 = vrot.slane %v1535_v59, 4  ;;  %v1092_v8 = vmax.f32 %v1038_v50, 0.0  ;;  %v1093_v56 = vmax.f32 %v1043_v5, 0.0  ;;  %v1055_v20 = vpop.f32.mrf.mxu1 }
 0x2bb   :  { %v1518_v61 = vmax.f32 %v1516_v23, %v1517_v27  ;;  %v1524_v57 = vrot.slane %v1523_v36, 2  ;;  %v1531_v6 = vrot.slane %v1530_v43, 2  ;;  %v3525_v15 = vadd.f32 %v3477_v24, %v1045_v29 }
 0x2bc   :  { %v1537_v53 = vmax.f32 %v1535_v59, %v1536_v37  ;;  %v1172_v34 = vcombine.high %v1092_v8, %v1092_v8  ;;  %v1179_v18 = vrot.slane %v1092_v8, %v3481_v33  ;;  %v1189_v14 = vcombine.high %v1093_v56, %v1093_v56  ;;  %v3528_v38 = vpop.f32.mrf.mxu1 }
 0x2bd   :  { %v1519_v28 = vrot.slane %v1518_v61, 1  ;;  %v1525_v47 = vmax.f32 %v1523_v36, %v1524_v57  ;;  %v1532_v52 = vmax.f32 %v1530_v43, %v1531_v6  ;;  %v1196_v60 = vrot.slane %v1093_v56, %v3481_v33 }
 0x2be   :  { %v1538_v39 = vrot.slane %v1537_v53, 2  ;;  %v1186_v63 = vrot.slane %v1172_v34, %v3481_v33  ;;  %v1187_v4 = vcombine.high %v1179_v18, %v1179_v18  ;;  %v1542_v31 = vsel %vm1457_vm8, %v1179_v18, -inf  ;;  %v1060_v29 = vpop.f32.mrf.mxu1 }
 0x2bf   :  { %v1520_v41 = vmax.f32 %v1518_v61, %v1519_v28  ;;  %v1526_v51 = vrot.slane %v1525_v47, 1  ;;  %v1533_v35 = vrot.slane %v1532_v52, 1  ;;  %v1543_v22 = vrot.slane %v1542_v31, 4 }
 0x2c0   :  { %v1539_v46 = vmax.f32 %v1537_v53, %v1538_v39  ;;  %v1188_v26 = vcombine.high %v1186_v63, %v1186_v63  ;;  %v1549_v17 = vsel %vm1457_vm8, %v1187_v4, -inf  ;;  %v1556_v45 = vsel %vm1457_vm8, %v1186_v63, -inf  ;;  %v3535_v44 = vpop.f32.mrf.mxu1 }
 0x2c1   :  { %v1527_v21 = vmax.f32 %v1525_v47, %v1526_v51  ;;  %v1534_v2 = vmax.f32 %v1532_v52, %v1533_v35  ;;  %v1544_v9 = vmax.f32 %v1542_v31, %v1543_v22  ;;  %v1550_v54 = vrot.slane %v1549_v17, 4 }
 0x2c2   :  { %v1540_v10 = vrot.slane %v1539_v46, 1  ;;  %v1557_v11 = vrot.slane %v1556_v45, 4  ;;  %v1563_v12 = vsel %vm1457_vm8, %v1188_v26, -inf  ;;  %v1203_v49 = vrot.slane %v1189_v14, %v3481_v33  ;;  %v1063_v62 = vpop.f32.mrf.mxu1  ;;  %v2798_v26 = vld [vmem:[%s3871_s5 + $0x78] sm:$0xff]  }
 0x2c3   :  { %v1979_v13 = vsel %vm1970_vm9, %v1527_v21, %v1520_v41  ;;  %v1545_v25 = vrot.slane %v1544_v9, 2  ;;  %v1551_v16 = vmax.f32 %v1549_v17, %v1550_v54  ;;  %v1564_v40 = vrot.slane %v1563_v12, 4  ;;  %v2799_v17 = vld [vmem:[%s3871_s5 + $0x38] sm:$0xff]   ;;  %2572 = vmatprep.subr.bf16.mxu0 %v2798_v26 }
 0x2c4   :  { %v3540_v58 = vmax.f32 %v1539_v46, %v1540_v10  ;;  %v3543_v23 = vsel %vm1972_vm10, %v1534_v2, %v1979_v13  ;;  %v1558_v42 = vmax.f32 %v1556_v45, %v1557_v11  ;;  %v1204_v48 = vcombine.high %v1196_v60, %v1196_v60  ;;  %v3545_v59 = vpop.f32.mrf.mxu1  ;;  %v2800_v45 = vld [vmem:[%s3871_s5 + $0x70] sm:$0xff]   ;;  %2573 = vmatpush3.bf16.msra.mxu0 %v2799_v17 }
 0x2c5   :  { %v1546_v50 = vmax.f32 %v1544_v9, %v1545_v25  ;;  %v1552_v5 = vrot.slane %v1551_v16, 2  ;;  %v1565_v1 = vmax.f32 %v1563_v12, %v1564_v40  ;;  %v1205_v27 = vcombine.high %v1203_v49, %v1203_v49  ;;  %2574 = vmatprep.subr.bf16.mxu0 %v2800_v45 }
 0x2c6   :  { %v1559_v36 = vrot.slane %v1558_v42, 2  ;;  %v1570_v43 = vsel %vm1457_vm8, %v1196_v60, -inf  ;;  %v1577_v37 = vsel %vm1457_vm8, %v1204_v48, -inf  ;;  %v1584_v8 = vsel %vm1457_vm8, %v1203_v49, -inf  ;;  %v1068_v56 = vpop.f32.mrf.mxu1 }
 0x2c7   :  { %v1547_v20 = vrot.slane %v1546_v50, 1  ;;  %v1553_v61 = vmax.f32 %v1551_v16, %v1552_v5  ;;  %v1566_v57 = vrot.slane %v1565_v1, 2  ;;  %v1571_v6 = vrot.slane %v1570_v43, 4 }
 0x2c8   :  { %v1560_v53 = vmax.f32 %v1558_v42, %v1559_v36  ;;  %v1578_v34 = vrot.slane %v1577_v37, 4  ;;  %v1585_v18 = vrot.slane %v1584_v8, 4  ;;  %v1591_v14 = vsel %vm1457_vm8, %v1205_v27, -inf  ;;  %v3551_v28 = vpop.f32.mrf.mxu1  ;;  %v2801_v42 = vld [vmem:[%s3871_s5 + $0x30] sm:$0xff]   ;;  %v2802_v27 = vld [vmem:[%s3871_s5 + $0x68] sm:$0xff]  }
 0x2c9   :  { %v1548_v47 = vmax.f32 %v1546_v50, %v1547_v20  ;;  %v1554_v52 = vrot.slane %v1553_v61, 1  ;;  %v1567_v39 = vmax.f32 %v1565_v1, %v1566_v57  ;;  %v1572_v60 = vmax.f32 %v1570_v43, %v1571_v6  ;;  %2575 = vmatpush3.bf16.msra.mxu0 %v2801_v42 }
 0x2ca   :  { %v1561_v63 = vrot.slane %v1560_v53, 1  ;;  %v1579_v4 = vmax.f32 %v1577_v37, %v1578_v34  ;;  %v1586_v31 = vmax.f32 %v1584_v8, %v1585_v18  ;;  %v1592_v29 = vrot.slane %v1591_v14, 4  ;;  %v1071_v41 = vpop.f32.mrf.mxu1  ;;  %2576 = vmatprep.subr.bf16.mxu0 %v2802_v27 }
 0x2cb   :  { %v1555_v51 = vmax.f32 %v1553_v61, %v1554_v52  ;;  %v1568_v35 = vrot.slane %v1567_v39, 1  ;;  %v1573_v22 = vrot.slane %v1572_v60, 2  ;;  %v1094_v46 = vmax.f32 %v3525_v15, 0.0 }
 0x2cc   :  { %v1562_v21 = vmax.f32 %v1560_v53, %v1561_v63  ;;  %v1580_v2 = vrot.slane %v1579_v4, 2  ;;  %v1587_v9 = vrot.slane %v1586_v31, 2  ;;  %v1593_v54 = vmax.f32 %v1591_v14, %v1592_v29  ;;  %v3563_v10 = vpop.f32.mrf.mxu1  ;;  %v2804_v63 = vld [vmem:[%s3871_s5 + $0x60] sm:$0xff]  }
 0x2cd   :  { %v3565_v11 = vmax.f32 %v1567_v39, %v1568_v35  ;;  %v1982_v15 = vsel %vm1970_vm9, %v1555_v51, %v1548_v47  ;;  %v1574_v12 = vmax.f32 %v1572_v60, %v1573_v22  ;;  %v1206_v49 = vcombine.high %v1094_v46, %v1094_v46  ;;  %v2803_v47 = vld [vmem:[%s3871_s5 + $0x28] sm:$0xff]  }
 0x2ce   :  { %v3569_v62 = vsel %vm1972_vm10, %v1562_v21, %v1982_v15  ;;  %v1581_v13 = vmax.f32 %v1579_v4, %v1580_v2  ;;  %v1588_v25 = vmax.f32 %v1586_v31, %v1587_v9  ;;  %v1594_v16 = vrot.slane %v1593_v54, 2  ;;  %v1076_v40 = vpop.f32.mrf.mxu1  ;;  %2577 = vmatpush3.bf16.msra.mxu0 %v2803_v47 }
 0x2cf   :  { %v1575_v48 = vrot.slane %v1574_v12, 1  ;;  %v1213_v50 = vrot.slane %v1094_v46, %v3481_v33  ;;  %v1220_v5 = vrot.slane %v1206_v49, %v3481_v33  ;;  %v1051_v1 = vadd.f32 %v3477_v24, %v3508_v30  ;;  %2578 = vmatprep.subr.bf16.mxu0 %v2804_v63 }
 0x2d0   :  { %v1582_v36 = vrot.slane %v1581_v13, 1  ;;  %v1589_v43 = vrot.slane %v1588_v25, 1  ;;  %v1595_v37 = vmax.f32 %v1593_v54, %v1594_v16  ;;  %v1054_v8 = vadd.f32 %v3477_v24, %v3518_v0  ;;  %v3583_v56 = vpop.f32.mrf.mxu1  ;;  %v2805_v54 = vld [vmem:[%s3871_s5 + $0x20] sm:$0xff]  }
 0x2d1   :  { %v1576_v20 = vmax.f32 %v1574_v12, %v1575_v48  ;;  %v1221_v61 = vcombine.high %v1213_v50, %v1213_v50  ;;  %v1222_v57 = vcombine.high %v1220_v5, %v1220_v5  ;;  %v1598_v6 = vsel %vm1457_vm8, %v1213_v50, -inf }
 0x2d2   :  { %v1583_v53 = vmax.f32 %v1581_v13, %v1582_v36  ;;  %v1590_v30 = vmax.f32 %v1588_v25, %v1589_v43  ;;  %v1596_v34 = vrot.slane %v1595_v37, 1  ;;  %v1599_v18 = vrot.slane %v1598_v6, 4  ;;  %v1079_v14 = vpop.f32.mrf.mxu1  ;;  %v2806_v25 = vld [vmem:[%s3871_s5 + $0x58] sm:$0xff]   ;;  %2579 = vmatpush3.bf16.msra.mxu0 %v2805_v54 }
 0x2d3   :  { %v1605_v52 = vsel %vm1457_vm8, %v1221_v61, -inf  ;;  %v1612_v0 = vsel %vm1457_vm8, %v1220_v5, -inf  ;;  %v1619_v39 = vsel %vm1457_vm8, %v1222_v57, -inf  ;;  %v1095_v60 = vmax.f32 %v1051_v1, 0.0  ;;  %v2807_v61 = vld [vmem:[%s3871_s5 + $0x18] sm:$0xff]   ;;  %2580 = vmatprep.subr.bf16.mxu0 %v2806_v25 }
 0x2d4   :  { %v3595_v4 = vmax.f32 %v1595_v37, %v1596_v34  ;;  %v1985_v31 = vsel %vm1970_vm9, %v1583_v53, %v1576_v20  ;;  %v1600_v29 = vmax.f32 %v1598_v6, %v1599_v18  ;;  %v1606_v41 = vrot.slane %v1605_v52, 4  ;;  %v3598_v51 = vpop.f32.mrf.mxu1  ;;  %v2808_v34 = vld [vmem:[%s3871_s5 + $0x50] sm:$0xff]  }
 0x2d5   :  { %v3601_v35 = vsel %vm1972_vm10, %v1590_v30, %v1985_v31  ;;  %v1613_v22 = vrot.slane %v1612_v0, 4  ;;  %v1620_v46 = vrot.slane %v1619_v39, 4  ;;  %v1223_v26 = vcombine.high %v1095_v60, %v1095_v60 }
 0x2d6   :  { %v1601_v17 = vrot.slane %v1600_v29, 2  ;;  %v1607_v45 = vmax.f32 %v1605_v52, %v1606_v41  ;;  %v1230_v21 = vrot.slane %v1095_v60, %v3481_v33  ;;  %v1096_v2 = vmax.f32 %v1054_v8, 0.0  ;;  %v1084_v9 = vpop.f32.mrf.mxu1  ;;  %2581 = vmatpush3.bf16.msra.mxu0 %v2807_v61 }
 0x2d7   :  { %v1614_v15 = vmax.f32 %v1612_v0, %v1613_v22  ;;  %v1621_v12 = vmax.f32 %v1619_v39, %v1620_v46  ;;  %v1237_v49 = vrot.slane %v1223_v26, %v3481_v33  ;;  %v3610_v13 = vadd.f32 %v3477_v24, %v3528_v38  ;;  %v2809_v46 = vld [vmem:[%s3871_s5 + $0x10] sm:$0xff]   ;;  %2582 = vmatprep.subr.bf16.mxu0 %v2808_v34  ;;  %v2810_v9 = vld [vmem:[%s3871_s5 + $0x48] sm:$0xff]  }
 0x2d8   :  { %v1602_v16 = vmax.f32 %v1600_v29, %v1601_v17  ;;  %v1608_v40 = vrot.slane %v1607_v45, 2  ;;  %v1238_v42 = vcombine.high %v1230_v21, %v1230_v21  ;;  %v1626_v48 = vsel %vm1457_vm8, %v1230_v21, -inf  ;;  %v3616_v50 = vpop.f32.mrf.mxu1 }
 0x2d9   :  { %v1615_v5 = vrot.slane %v1614_v15, 2  ;;  %v1622_v1 = vrot.slane %v1621_v12, 2  ;;  %v1239_v27 = vcombine.high %v1237_v49, %v1237_v49  ;;  %v1627_v36 = vrot.slane %v1626_v48, 4 }
 0x2da   :  { %v1603_v43 = vrot.slane %v1602_v16, 1  ;;  %v1609_v37 = vmax.f32 %v1607_v45, %v1608_v40  ;;  %v1633_v38 = vsel %vm1457_vm8, %v1238_v42, -inf  ;;  %v1640_v8 = vsel %vm1457_vm8, %v1237_v49, -inf  ;;  %v1087_v20 = vpop.f32.mrf.mxu1  ;;  %2583 = vmatpush3.bf16.msra.mxu0 %v2809_v46 }
 0x2db   :  { %v1616_v57 = vmax.f32 %v1614_v15, %v1615_v5  ;;  %v1623_v6 = vmax.f32 %v1621_v12, %v1622_v1  ;;  %v1628_v53 = vmax.f32 %v1626_v48, %v1627_v36  ;;  %v1634_v30 = vrot.slane %v1633_v38, 4  ;;  %v2811_v36 = vld [vmem:[%s3871_s5 + $0x8] sm:$0xff]   ;;  %2584 = vmatprep.subr.bf16.mxu0 %v2810_v9 }
 0x2dc   :  { %v1604_v18 = vmax.f32 %v1602_v16, %v1603_v43  ;;  %v1610_v14 = vrot.slane %v1609_v37, 1  ;;  %v1641_v47 = vrot.slane %v1640_v8, 4  ;;  %v1647_v52 = vsel %vm1457_vm8, %v1239_v27, -inf }
 0x2dd   :  { %v1617_v0 = vrot.slane %v1616_v57, 1  ;;  %v1624_v39 = vrot.slane %v1623_v6, 1  ;;  %v1629_v60 = vrot.slane %v1628_v53, 2  ;;  %v1635_v63 = vmax.f32 %v1633_v38, %v1634_v30 }
 0x2de   :  { %v1611_v31 = vmax.f32 %v1609_v37, %v1610_v14  ;;  %v1642_v29 = vmax.f32 %v1640_v8, %v1641_v47  ;;  %v1648_v41 = vrot.slane %v1647_v52, 4  ;;  %v1240_v22 = vcombine.high %v1096_v2, %v1096_v2  ;;  %2585 = vmatpush3.bf16.msra.mxu0 %v2811_v36 }
 0x2df   :  { %v1618_v26 = vmax.f32 %v1616_v57, %v1617_v0  ;;  %v3630_v17 = vmax.f32 %v1623_v6, %v1624_v39  ;;  %v1630_v45 = vmax.f32 %v1628_v53, %v1629_v60  ;;  %v1636_v21 = vrot.slane %v1635_v63, 2 }
 0x2e0   :  { %v1988_v54 = vsel %vm1970_vm9, %v1611_v31, %v1604_v18  ;;  %v1643_v15 = vrot.slane %v1642_v29, 2  ;;  %v1649_v12 = vmax.f32 %v1647_v52, %v1648_v41  ;;  %v1247_v49 = vrot.slane %v1096_v2, %v3481_v33 }
 0x2e1   :  { %v3638_v25 = vsel %vm1972_vm10, %v1618_v26, %v1988_v54  ;;  %v1631_v16 = vrot.slane %v1630_v45, 1  ;;  %v1637_v40 = vmax.f32 %v1635_v63, %v1636_v21  ;;  %v1254_v42 = vrot.slane %v1240_v22, %v3481_v33 }
 0x2e2   :  { %v1644_v48 = vmax.f32 %v1642_v29, %v1643_v15  ;;  %v1650_v5 = vrot.slane %v1649_v12, 2  ;;  %v1255_v1 = vcombine.high %v1247_v49, %v1247_v49  ;;  %v1654_v27 = vsel %vm1457_vm8, %v1247_v49, -inf }
 0x2e3   :  { %v1632_v43 = vmax.f32 %v1630_v45, %v1631_v16  ;;  %v1638_v37 = vrot.slane %v1637_v40, 1  ;;  %v1256_v2 = vcombine.high %v1254_v42, %v1254_v42  ;;  %v1655_v38 = vrot.slane %v1654_v27, 4 }
 0x2e4   :  { %v1645_v8 = vrot.slane %v1644_v48, 1  ;;  %v1651_v20 = vmax.f32 %v1649_v12, %v1650_v5  ;;  %v1661_v61 = vsel %vm1457_vm8, %v1255_v1, -inf  ;;  %v1668_v57 = vsel %vm1457_vm8, %v1254_v42, -inf }
 0x2e5   :  { %v1639_v6 = vmax.f32 %v1637_v40, %v1638_v37  ;;  %v1656_v53 = vmax.f32 %v1654_v27, %v1655_v38  ;;  %v1662_v30 = vrot.slane %v1661_v61, 4  ;;  %v1669_v34 = vrot.slane %v1668_v57, 4 }
 0x2e6   :  { %v1646_v18 = vmax.f32 %v1644_v48, %v1645_v8  ;;  %v1652_v14 = vrot.slane %v1651_v20, 1  ;;  %v1675_v47 = vsel %vm1457_vm8, %v1256_v2, -inf  ;;  %v1097_v52 = vmax.f32 %v3610_v13, 0.0 }
 0x2e7   :  { %v1991_v0 = vsel %vm1970_vm9, %v1639_v6, %v1632_v43  ;;  %v1657_v39 = vrot.slane %v1656_v53, 2  ;;  %v1663_v60 = vmax.f32 %v1661_v61, %v1662_v30  ;;  %v1670_v63 = vmax.f32 %v1668_v57, %v1669_v34 }
 0x2e8   :  { %v3650_v31 = vmax.f32 %v1651_v20, %v1652_v14  ;;  %v3653_v29 = vsel %vm1972_vm10, %v1646_v18, %v1991_v0  ;;  %v1676_v41 = vrot.slane %v1675_v47, 4  ;;  %v1257_v22 = vcombine.high %v1097_v52, %v1097_v52 }
 0x2e9   :  { %v1658_v46 = vmax.f32 %v1656_v53, %v1657_v39  ;;  %v1664_v26 = vrot.slane %v1663_v60, 2  ;;  %v1671_v45 = vrot.slane %v1670_v63, 2  ;;  %v1264_v21 = vrot.slane %v1097_v52, %v3481_v33 }
 0x2ea   :  { %v1677_v9 = vmax.f32 %v1675_v47, %v1676_v41  ;;  %v1271_v13 = vrot.slane %v1257_v22, %v3481_v33  ;;  %v1062_v54 = vadd.f32 %v3477_v24, %v3535_v44  ;;  %v1067_v15 = vadd.f32 %v3477_v24, %v3545_v59 }
 0x2eb   :  { %v1659_v12 = vrot.slane %v1658_v46, 1  ;;  %v1665_v49 = vmax.f32 %v1663_v60, %v1664_v26  ;;  %v1672_v16 = vmax.f32 %v1670_v63, %v1671_v45  ;;  %v1272_v40 = vcombine.high %v1264_v21, %v1264_v21 }
 0x2ec   :  { %v1678_v42 = vrot.slane %v1677_v9, 2  ;;  %v1273_v48 = vcombine.high %v1271_v13, %v1271_v13  ;;  %v1682_v5 = vsel %vm1457_vm8, %v1264_v21, -inf  ;;  %v1696_v1 = vsel %vm1457_vm8, %v1271_v13, -inf }
 0x2ed   :  { %v1660_v27 = vmax.f32 %v1658_v46, %v1659_v12  ;;  %v1666_v36 = vrot.slane %v1665_v49, 1  ;;  %v1673_v43 = vrot.slane %v1672_v16, 1  ;;  %v1683_v37 = vrot.slane %v1682_v5, 4 }
 0x2ee   :  { %v1679_v2 = vmax.f32 %v1677_v9, %v1678_v42  ;;  %v1689_v44 = vsel %vm1457_vm8, %v1272_v40, -inf  ;;  %v1697_v38 = vrot.slane %v1696_v1, 4  ;;  %v1703_v59 = vsel %vm1457_vm8, %v1273_v48, -inf }
 0x2ef   :  { %v1667_v8 = vmax.f32 %v1665_v49, %v1666_v36  ;;  %v1674_v20 = vmax.f32 %v1672_v16, %v1673_v43  ;;  %v1684_v61 = vmax.f32 %v1682_v5, %v1683_v37  ;;  %v1690_v57 = vrot.slane %v1689_v44, 4 }
 0x2f0   :  { %v1680_v6 = vrot.slane %v1679_v2, 1  ;;  %v1698_v53 = vmax.f32 %v1696_v1, %v1697_v38  ;;  %v1704_v30 = vrot.slane %v1703_v59, 4  ;;  %v1098_v34 = vmax.f32 %v1062_v54, 0.0 }
 0x2f1   :  { %v1994_v18 = vsel %vm1970_vm9, %v1667_v8, %v1660_v27  ;;  %v1685_v14 = vrot.slane %v1684_v61, 2  ;;  %v1691_v47 = vmax.f32 %v1689_v44, %v1690_v57  ;;  %v1099_v52 = vmax.f32 %v1067_v15, 0.0 }
 0x2f2   :  { %v3666_v0 = vmax.f32 %v1679_v2, %v1680_v6  ;;  %v3669_v39 = vsel %vm1972_vm10, %v1674_v20, %v1994_v18  ;;  %v1699_v60 = vrot.slane %v1698_v53, 2  ;;  %v1705_v63 = vmax.f32 %v1703_v59, %v1704_v30 }
 0x2f3   :  { %v1686_v41 = vmax.f32 %v1684_v61, %v1685_v14  ;;  %v1692_v22 = vrot.slane %v1691_v47, 2  ;;  %v1274_v46 = vcombine.high %v1098_v34, %v1098_v34  ;;  %v1281_v26 = vrot.slane %v1098_v34, %v3481_v33 }
 0x2f4   :  { %v1700_v45 = vmax.f32 %v1698_v53, %v1699_v60  ;;  %v1706_v21 = vrot.slane %v1705_v63, 2  ;;  %v1291_v9 = vcombine.high %v1099_v52, %v1099_v52  ;;  %v1298_v13 = vrot.slane %v1099_v52, %v3481_v33 }
 0x2f5   :  { %v1687_v54 = vrot.slane %v1686_v41, 1  ;;  %v1693_v12 = vmax.f32 %v1691_v47, %v1692_v22  ;;  %v1288_v15 = vrot.slane %v1274_v46, %v3481_v33  ;;  %v1289_v49 = vcombine.high %v1281_v26, %v1281_v26 }
 0x2f6   :  { %v1701_v16 = vrot.slane %v1700_v45, 1  ;;  %v1707_v40 = vmax.f32 %v1705_v63, %v1706_v21  ;;  %v1710_v42 = vsel %vm1457_vm8, %v1281_v26, -inf  ;;  %v1305_v48 = vrot.slane %v1291_v9, %v3481_v33 }
 0x2f7   :  { %v1688_v5 = vmax.f32 %v1686_v41, %v1687_v54  ;;  %v1694_v1 = vrot.slane %v1693_v12, 1  ;;  %v1290_v27 = vcombine.high %v1288_v15, %v1288_v15  ;;  %v1711_v36 = vrot.slane %v1710_v42, 4 }
 0x2f8   :  { %v1702_v43 = vmax.f32 %v1700_v45, %v1701_v16  ;;  %v1708_v37 = vrot.slane %v1707_v40, 1  ;;  %v1717_v2 = vsel %vm1457_vm8, %v1289_v49, -inf  ;;  %v1724_v44 = vsel %vm1457_vm8, %v1288_v15, -inf }
 0x2f9   :  { %v1695_v38 = vmax.f32 %v1693_v12, %v1694_v1  ;;  %v1712_v59 = vmax.f32 %v1710_v42, %v1711_v36  ;;  %v1718_v8 = vrot.slane %v1717_v2, 4  ;;  %v1725_v20 = vrot.slane %v1724_v44, 4 }
 0x2fa   :  { %v3678_v61 = vmax.f32 %v1707_v40, %v1708_v37  ;;  %v1731_v57 = vsel %vm1457_vm8, %v1290_v27, -inf  ;;  %v1306_v6 = vcombine.high %v1298_v13, %v1298_v13  ;;  %v1307_v53 = vcombine.high %v1305_v48, %v1305_v48 }
 0x2fb   :  { %v1997_v30 = vsel %vm1970_vm9, %v1695_v38, %v1688_v5  ;;  %v1713_v34 = vrot.slane %v1712_v59, 2  ;;  %v1719_v18 = vmax.f32 %v1717_v2, %v1718_v8  ;;  %v1726_v14 = vmax.f32 %v1724_v44, %v1725_v20 }
 0x2fc   :  { %v3683_v47 = vsel %vm1972_vm10, %v1702_v43, %v1997_v30  ;;  %v1732_v52 = vrot.slane %v1731_v57, 4  ;;  %v1738_v60 = vsel %vm1457_vm8, %v1298_v13, -inf  ;;  %v1745_v63 = vsel %vm1457_vm8, %v1306_v6, -inf }
 0x2fd   :  { %v1714_v41 = vmax.f32 %v1712_v59, %v1713_v34  ;;  %v1720_v22 = vrot.slane %v1719_v18, 2  ;;  %v1727_v46 = vrot.slane %v1726_v14, 2  ;;  %v1739_v26 = vrot.slane %v1738_v60, 4 }
 0x2fe   :  { %v1733_v45 = vmax.f32 %v1731_v57, %v1732_v52  ;;  %v1746_v21 = vrot.slane %v1745_v63, 4  ;;  %v1752_v9 = vsel %vm1457_vm8, %v1305_v48, -inf  ;;  %v1759_v54 = vsel %vm1457_vm8, %v1307_v53, -inf }
 0x2ff   :  { %v1715_v12 = vrot.slane %v1714_v41, 1  ;;  %v1721_v15 = vmax.f32 %v1719_v18, %v1720_v22  ;;  %v1728_v49 = vmax.f32 %v1726_v14, %v1727_v46  ;;  %v1740_v16 = vmax.f32 %v1738_v60, %v1739_v26 }
 0x300   :  { %v1734_v40 = vrot.slane %v1733_v45, 2  ;;  %v1747_v42 = vmax.f32 %v1745_v63, %v1746_v21  ;;  %v1753_v5 = vrot.slane %v1752_v9, 4  ;;  %v1760_v13 = vrot.slane %v1759_v54, 4 }
 0x301   :  { %v1716_v1 = vmax.f32 %v1714_v41, %v1715_v12  ;;  %v1722_v27 = vrot.slane %v1721_v15, 1  ;;  %v1729_v36 = vrot.slane %v1728_v49, 1  ;;  %v1741_v43 = vrot.slane %v1740_v16, 2 }
 0x302   :  { %v1735_v37 = vmax.f32 %v1733_v45, %v1734_v40  ;;  %v1748_v2 = vrot.slane %v1747_v42, 2  ;;  %v1754_v44 = vmax.f32 %v1752_v9, %v1753_v5  ;;  %v1761_v38 = vmax.f32 %v1759_v54, %v1760_v13 }
 0x303   :  { %v1723_v59 = vmax.f32 %v1721_v15, %v1722_v27  ;;  %v1730_v48 = vmax.f32 %v1728_v49, %v1729_v36  ;;  %v1742_v8 = vmax.f32 %v1740_v16, %v1741_v43  ;;  %v1070_v20 = vadd.f32 %v3477_v24, %v3551_v28 }
 0x304   :  { %v1736_v57 = vrot.slane %v1735_v37, 1  ;;  %v1749_v6 = vmax.f32 %v1747_v42, %v1748_v2  ;;  %v1755_v53 = vrot.slane %v1754_v44, 2  ;;  %v1762_v30 = vrot.slane %v1761_v38, 2 }
 0x305   :  { %v2000_v34 = vsel %vm1970_vm9, %v1723_v59, %v1716_v1  ;;  %v1743_v18 = vrot.slane %v1742_v8, 1  ;;  %v1100_v14 = vmax.f32 %v1070_v20, 0.0  ;;  %v1075_v52 = vadd.f32 %v3477_v24, %v3563_v10 }
 0x306   :  { %v3694_v60 = vmax.f32 %v1735_v37, %v1736_v57  ;;  %v3697_v63 = vsel %vm1972_vm10, %v1730_v48, %v2000_v34  ;;  %v1750_v41 = vrot.slane %v1749_v6, 1  ;;  %v1756_v22 = vmax.f32 %v1754_v44, %v1755_v53 }
 0x307   :  { %v1744_v46 = vmax.f32 %v1742_v8, %v1743_v18  ;;  %v1763_v28 = vmax.f32 %v1761_v38, %v1762_v30  ;;  %v1308_v26 = vcombine.high %v1100_v14, %v1100_v14  ;;  %v1315_v45 = vrot.slane %v1100_v14, %v3481_v33 }
 0x308   :  { %v1751_v21 = vmax.f32 %v1749_v6, %v1750_v41  ;;  %v1757_v9 = vrot.slane %v1756_v22, 1  ;;  %v1101_v54 = vmax.f32 %v1075_v52, 0.0  ;;  %v1078_v12 = vadd.f32 %v3477_v24, %v3583_v56 }
 0x309   :  { %v1764_v15 = vrot.slane %v1763_v28, 1  ;;  %v1322_v10 = vrot.slane %v1308_v26, %v3481_v33  ;;  %v1323_v49 = vcombine.high %v1315_v45, %v1315_v45  ;;  %v1766_v16 = vsel %vm1457_vm8, %v1315_v45, -inf }
 0x30a   :  { %v1758_v40 = vmax.f32 %v1756_v22, %v1757_v9  ;;  %v2003_v42 = vsel %vm1970_vm9, %v1751_v21, %v1744_v46  ;;  %v1767_v5 = vrot.slane %v1766_v16, 4  ;;  %v1325_v13 = vcombine.high %v1101_v54, %v1101_v54 }
 0x30b   :  { %v3705_v1 = vmax.f32 %v1763_v28, %v1764_v15  ;;  %v1324_v27 = vcombine.high %v1322_v10, %v1322_v10  ;;  %v1773_v36 = vsel %vm1457_vm8, %v1323_v49, -inf  ;;  %v1780_v43 = vsel %vm1457_vm8, %v1322_v10, -inf }
 0x30c   :  { %v3710_v24 = vsel %vm1972_vm10, %v1758_v40, %v2003_v42  ;;  %v1768_v56 = vmax.f32 %v1766_v16, %v1767_v5  ;;  %v1774_v37 = vrot.slane %v1773_v36, 4  ;;  %v1781_v2 = vrot.slane %v1780_v43, 4 }
 0x30d   :  { %v1787_v44 = vsel %vm1457_vm8, %v1324_v27, -inf  ;;  %v1332_v38 = vrot.slane %v1101_v54, %v3481_v33  ;;  %v1339_v59 = vrot.slane %v1325_v13, %v3481_v33  ;;  %v1102_v48 = vmax.f32 %v1078_v12, 0.0 }
 0x30e   :  { %v1769_v8 = vrot.slane %v1768_v56, 2  ;;  %v1775_v20 = vmax.f32 %v1773_v36, %v1774_v37  ;;  %v1782_v57 = vmax.f32 %v1780_v43, %v1781_v2  ;;  %v1788_v6 = vrot.slane %v1787_v44, 4 }
 0x30f   :  { %v1340_v53 = vcombine.high %v1332_v38, %v1332_v38  ;;  %v1341_v30 = vcombine.high %v1339_v59, %v1339_v59  ;;  %v1794_v34 = vsel %vm1457_vm8, %v1332_v38, -inf  ;;  %v1808_v18 = vsel %vm1457_vm8, %v1339_v59, -inf }
 0x310   :  { %v1770_v14 = vmax.f32 %v1768_v56, %v1769_v8  ;;  %v1776_v52 = vrot.slane %v1775_v20, 2  ;;  %v1783_v41 = vrot.slane %v1782_v57, 2  ;;  %v1789_v22 = vmax.f32 %v1787_v44, %v1788_v6 }
 0x311   :  { %v1795_v46 = vrot.slane %v1794_v34, 4  ;;  %v1801_v28 = vsel %vm1457_vm8, %v1340_v53, -inf  ;;  %v1809_v26 = vrot.slane %v1808_v18, 4  ;;  %v1815_v45 = vsel %vm1457_vm8, %v1341_v30, -inf }
 0x312   :  { %v1771_v21 = vrot.slane %v1770_v14, 1  ;;  %v1777_v9 = vmax.f32 %v1775_v20, %v1776_v52  ;;  %v1784_v54 = vmax.f32 %v1782_v57, %v1783_v41  ;;  %v1790_v12 = vrot.slane %v1789_v22, 2 }
 0x313   :  { %v1796_v15 = vmax.f32 %v1794_v34, %v1795_v46  ;;  %v1802_v10 = vrot.slane %v1801_v28, 4  ;;  %v1810_v49 = vmax.f32 %v1808_v18, %v1809_v26  ;;  %v1816_v16 = vrot.slane %v1815_v45, 4 }
 0x314   :  { %v1772_v40 = vmax.f32 %v1770_v14, %v1771_v21  ;;  %v1778_v42 = vrot.slane %v1777_v9, 1  ;;  %v1785_v5 = vrot.slane %v1784_v54, 1  ;;  %v1791_v13 = vmax.f32 %v1789_v22, %v1790_v12 }
 0x315   :  { %v1797_v27 = vrot.slane %v1796_v15, 2  ;;  %v1803_v36 = vmax.f32 %v1801_v28, %v1802_v10  ;;  %v1811_v43 = vrot.slane %v1810_v49, 2  ;;  %v1817_v56 = vmax.f32 %v1815_v45, %v1816_v16 }
 0x316   :  { %v1779_v37 = vmax.f32 %v1777_v9, %v1778_v42  ;;  %v1786_v2 = vmax.f32 %v1784_v54, %v1785_v5  ;;  %v1792_v44 = vrot.slane %v1791_v13, 1  ;;  %v1342_v38 = vcombine.high %v1102_v48, %v1102_v48 }
 0x317   :  { %v1798_v59 = vmax.f32 %v1796_v15, %v1797_v27  ;;  %v1804_v8 = vrot.slane %v1803_v36, 2  ;;  %v1812_v20 = vmax.f32 %v1810_v49, %v1811_v43  ;;  %v1818_v57 = vrot.slane %v1817_v56, 2  ;;  %v2822_v27 = vld [vmem:[%s3870_s4] ss:$0 sm:$0xff] }
 0x318   :  { %v3719_v6 = vmax.f32 %v1791_v13, %v1792_v44  ;;  %v2006_v53 = vsel %vm1970_vm9, %v1779_v37, %v1772_v40  ;;  %v1349_v30 = vrot.slane %v1102_v48, %v3481_v33  ;;  %v1356_v34 = vrot.slane %v1342_v38, %v3481_v33 }
 0x319   :  { %v3725_v18 = vsel %vm1972_vm10, %v1786_v2, %v2006_v53  ;;  %v1799_v14 = vrot.slane %v1798_v59, 1  ;;  %v1805_v52 = vmax.f32 %v1803_v36, %v1804_v8  ;;  %v1813_v41 = vrot.slane %v1812_v20, 1 }
 0x31a   :  { %v1819_v22 = vmax.f32 %v1817_v56, %v1818_v57  ;;  %v1357_v46 = vcombine.high %v1349_v30, %v1349_v30  ;;  %v1358_v28 = vcombine.high %v1356_v34, %v1356_v34  ;;  %v1822_v26 = vsel %vm1457_vm8, %v1349_v30, -inf }
 0x31b   :  { %v1800_v45 = vmax.f32 %v1798_v59, %v1799_v14  ;;  %v1806_v21 = vrot.slane %v1805_v52, 1  ;;  %v1814_v9 = vmax.f32 %v1812_v20, %v1813_v41  ;;  %v1823_v54 = vrot.slane %v1822_v26, 4 }
 0x31c   :  { %v1820_v12 = vrot.slane %v1819_v22, 1  ;;  %v1829_v48 = vsel %vm1457_vm8, %v1357_v46, -inf  ;;  %v1836_v15 = vsel %vm1457_vm8, %v1356_v34, -inf  ;;  %v1843_v10 = vsel %vm1457_vm8, %v1358_v28, -inf }
 0x31d   :  { %v1807_v49 = vmax.f32 %v1805_v52, %v1806_v21  ;;  %v1824_v16 = vmax.f32 %v1822_v26, %v1823_v54  ;;  %v1830_v40 = vrot.slane %v1829_v48, 4  ;;  %v1837_v42 = vrot.slane %v1836_v15, 4 }
 0x31e   :  { %v3731_v5 = vmax.f32 %v1819_v22, %v1820_v12  ;;  %v1844_v13 = vrot.slane %v1843_v10, 4  ;;  %v1083_v36 = vadd.f32 %v2822_v27, %v3598_v51  ;;  %v1086_v43 = vadd.f32 %v2822_v27, %v3616_v50 }
 0x31f   :  { %v2009_v56 = vsel %vm1970_vm9, %v1807_v49, %v1800_v45  ;;  %v1825_v37 = vrot.slane %v1824_v16, 2  ;;  %v1831_v2 = vmax.f32 %v1829_v48, %v1830_v40  ;;  %v1838_v44 = vmax.f32 %v1836_v15, %v1837_v42 }
 0x320   :  { %v3740_v38 = vsel %vm1972_vm10, %v1814_v9, %v2009_v56  ;;  %v1845_v59 = vmax.f32 %v1843_v10, %v1844_v13  ;;  %v1103_v8 = vmax.f32 %v1083_v36, 0.0  ;;  %v1104_v20 = vmax.f32 %v1086_v43, 0.0 }
 0x321   :  { %v1826_v57 = vmax.f32 %v1824_v16, %v1825_v37  ;;  %v1832_v53 = vrot.slane %v1831_v2, 2  ;;  %v1839_v30 = vrot.slane %v1838_v44, 2  ;;  %v3745_v51 = vsel %vm1974_vm11, %v3499_v7, %v3504_v19 }
 0x322   :  { %v1846_v50 = vrot.slane %v1845_v59, 2  ;;  %v1359_v34 = vcombine.high %v1103_v8, %v1103_v8  ;;  %v1366_v14 = vrot.slane %v1103_v8, %v3481_v33  ;;  %v1376_v52 = vcombine.high %v1104_v20, %v1104_v20 }
 0x323   :  { %v1827_v41 = vrot.slane %v1826_v57, 1  ;;  %v1833_v22 = vmax.f32 %v1831_v2, %v1832_v53  ;;  %v1840_v46 = vmax.f32 %v1838_v44, %v1839_v30  ;;  %v1383_v28 = vrot.slane %v1104_v20, %v3481_v33 }
 0x324   :  { %v1847_v26 = vmax.f32 %v1845_v59, %v1846_v50  ;;  %v1373_v45 = vrot.slane %v1359_v34, %v3481_v33  ;;  %v1374_v21 = vcombine.high %v1366_v14, %v1366_v14  ;;  %v1850_v9 = vsel %vm1457_vm8, %v1366_v14, -inf }
 0x325   :  { %v1828_v54 = vmax.f32 %v1826_v57, %v1827_v41  ;;  %v1834_v12 = vrot.slane %v1833_v22, 1  ;;  %v1841_v7 = vrot.slane %v1840_v46, 1  ;;  %v1851_v19 = vrot.slane %v1850_v9, 4 }
 0x326   :  { %v1848_v48 = vrot.slane %v1847_v26, 1  ;;  %v1375_v15 = vcombine.high %v1373_v45, %v1373_v45  ;;  %v1857_v10 = vsel %vm1457_vm8, %v1374_v21, -inf  ;;  %v1864_v49 = vsel %vm1457_vm8, %v1373_v45, -inf }
 0x327   :  { %v1835_v16 = vmax.f32 %v1833_v22, %v1834_v12  ;;  %v1842_v40 = vmax.f32 %v1840_v46, %v1841_v7  ;;  %v1852_v42 = vmax.f32 %v1850_v9, %v1851_v19  ;;  %v1858_v13 = vrot.slane %v1857_v10, 4 }
 0x328   :  { %v3753_v27 = vmax.f32 %v1847_v26, %v1848_v48  ;;  %v1865_v36 = vrot.slane %v1864_v49, 4  ;;  %v1871_v43 = vsel %vm1457_vm8, %v1375_v15, -inf  ;;  %v1390_v56 = vrot.slane %v1376_v52, %v3481_v33 }
 0x329   :  { %v2012_v37 = vsel %vm1970_vm9, %v1835_v16, %v1828_v54  ;;  %v1853_v2 = vrot.slane %v1852_v42, 2  ;;  %v1859_v44 = vmax.f32 %v1857_v10, %v1858_v13  ;;  %v1872_v59 = vrot.slane %v1871_v43, 4 }
 0x32a   :  { %v3759_v8 = vsel %vm1972_vm10, %v1842_v40, %v2012_v37  ;;  %v1866_v20 = vmax.f32 %v1864_v49, %v1865_v36  ;;  %v1391_v57 = vcombine.high %v1383_v28, %v1383_v28  ;;  %v1392_v53 = vcombine.high %v1390_v56, %v1390_v56 }
 0x32b   :  { %v1854_v30 = vmax.f32 %v1852_v42, %v1853_v2  ;;  %v1860_v50 = vrot.slane %v1859_v44, 2  ;;  %v1873_v34 = vmax.f32 %v1871_v43, %v1872_v59  ;;  %v1878_v14 = vsel %vm1457_vm8, %v1383_v28, -inf }
 0x32c   :  { %v1867_v41 = vrot.slane %v1866_v20, 2  ;;  %v1879_v22 = vrot.slane %v1878_v14, 4  ;;  %v1885_v52 = vsel %vm1457_vm8, %v1391_v57, -inf  ;;  %v1892_v46 = vsel %vm1457_vm8, %v1390_v56, -inf }
 0x32d   :  { %v1855_v26 = vrot.slane %v1854_v30, 1  ;;  %v1861_v45 = vmax.f32 %v1859_v44, %v1860_v50  ;;  %v1874_v21 = vrot.slane %v1873_v34, 2  ;;  %v1886_v9 = vrot.slane %v1885_v52, 4 }
 0x32e   :  { %v1868_v54 = vmax.f32 %v1866_v20, %v1867_v41  ;;  %v1880_v12 = vmax.f32 %v1878_v14, %v1879_v22  ;;  %v1893_v7 = vrot.slane %v1892_v46, 4  ;;  %v1899_v19 = vsel %vm1457_vm8, %v1392_v53, -inf }
 0x32f   :  { %v1856_v48 = vmax.f32 %v1854_v30, %v1855_v26  ;;  %v1862_v15 = vrot.slane %v1861_v45, 1  ;;  %v1875_v10 = vmax.f32 %v1873_v34, %v1874_v21  ;;  %v1887_v49 = vmax.f32 %v1885_v52, %v1886_v9 }
 0x330   :  { %v1869_v28 = vrot.slane %v1868_v54, 1  ;;  %v1881_v16 = vrot.slane %v1880_v12, 2  ;;  %v1894_v40 = vmax.f32 %v1892_v46, %v1893_v7  ;;  %v1900_v42 = vrot.slane %v1899_v19, 4 }
 0x331   :  { %v1863_v13 = vmax.f32 %v1861_v45, %v1862_v15  ;;  %v1876_v36 = vrot.slane %v1875_v10, 1  ;;  %v1888_v43 = vrot.slane %v1887_v49, 2  ;;  %v1978_v56 = vsel %vm1974_vm11, %v3512_v3, %v3522_v32 }
 0x332   :  { %v1870_v37 = vmax.f32 %v1868_v54, %v1869_v28  ;;  %v1882_v2 = vmax.f32 %v1880_v12, %v1881_v16  ;;  %v1895_v44 = vrot.slane %v1894_v40, 2  ;;  %v1901_v59 = vmax.f32 %v1899_v19, %v1900_v42 }
 0x333   :  { %v1877_v20 = vmax.f32 %v1875_v10, %v1876_v36  ;;  %v2015_v57 = vsel %vm1970_vm9, %v1863_v13, %v1856_v48  ;;  %v1889_v53 = vmax.f32 %v1887_v49, %v1888_v43  ;;  %v1981_v30 = vsel %vm1974_vm11, %v3540_v58, %v3543_v23 }
 0x334   :  { %v2016_v50 = vsel %vm1972_vm10, %v1870_v37, %v2015_v57  ;;  %v1883_v34 = vrot.slane %v1882_v2, 1  ;;  %v1896_v14 = vmax.f32 %v1894_v40, %v1895_v44  ;;  %v1902_v41 = vrot.slane %v1901_v59, 2  ;;  %v2813_v37 = vld [vmem:[%s3871_s5] sm:$0xff]  }
 0x335   :  { %v1890_v22 = vrot.slane %v1889_v53, 1  ;;  %v1984_v3 = vsel %vm1974_vm11, %v3565_v11, %v3569_v62  ;;  %v1987_v32 = vsel %vm1974_vm11, %v3595_v4, %v3601_v35  ;;  %v1990_v52 = vsel %vm1974_vm11, %v3630_v17, %v3638_v25 }
 0x336   :  { %v1884_v46 = vmax.f32 %v1882_v2, %v1883_v34  ;;  %v1897_v58 = vrot.slane %v1896_v14, 1  ;;  %v1903_v23 = vmax.f32 %v1901_v59, %v1902_v41  ;;  %v1993_v26 = vsel %vm1974_vm11, %v3650_v31, %v3653_v29 }
 0x337   :  { %v1891_v45 = vmax.f32 %v1889_v53, %v1890_v22  ;;  %v1996_v11 = vsel %vm1974_vm11, %v3666_v0, %v3669_v39  ;;  %v1999_v62 = vsel %vm1974_vm11, %v3678_v61, %v3683_v47  ;;  %v2002_v4 = vsel %vm1974_vm11, %v3694_v60, %v3697_v63 }
 0x338   :  { %v1898_v35 = vmax.f32 %v1896_v14, %v1897_v58  ;;  %v1904_v17 = vrot.slane %v1903_v23, 1  ;;  %v2005_v25 = vsel %vm1974_vm11, %v3705_v1, %v3710_v24  ;;  %v2008_v31 = vsel %vm1974_vm11, %v3719_v6, %v3725_v18 }
 0x339   :  { %v2018_v29 = vsel %vm1970_vm9, %v1891_v45, %v1884_v46  ;;  %v2011_v0 = vsel %vm1974_vm11, %v3731_v5, %v3740_v38  ;;  %v2014_v39 = vsel %vm1974_vm11, %v3753_v27, %v3759_v8  ;;  %v2017_v61 = vsel %vm1974_vm11, %v1877_v20, %v2016_v50 }
 0x33a   :  { %v1905_v47 = vmax.f32 %v1903_v23, %v1904_v17  ;;  %v2019_v60 = vsel %vm1972_vm10, %v1898_v35, %v2018_v29  ;;  %v2037_v63 = vcombine.low %v3745_v51, %v1981_v30  ;;  %v2045_v1 = vcombine.low %v1978_v56, %v1984_v3  ;;  %v2812_v56 = vld [vmem:[%s3871_s5 + $0x40] sm:$0xff]  }
 0x33b   :  { %v2053_v24 = vcombine.low %v1987_v32, %v1993_v26  ;;  %v2061_v6 = vcombine.low %v1990_v52, %v1996_v11  ;;  %v2105_v18 = vcombine.low %v1999_v62, %v2005_v25  ;;  %v2850_v38 = vmov 1934713408   ;;  %2586 = vmatprep.subr.bf16.mxu0 %v2812_v56 }
 0x33c   :  { %v2020_v21 = vsel %vm1974_vm11, %v1905_v47, %v2019_v60  ;;  %v2044_v9 = vrot.slane %v2037_v63, %v3481_v33  ;;  %v2052_v5 = vrot.slane %v2045_v1, %v3481_v33  ;;  %v2072_v54 = vunpack.c.l.s4 %v2850_v38  ;;  %2587 = vmatpush3.bf16.msra.mxu0 %v2813_v37  ;;  %v2815_v60 = vld [vmem:[%s3873_s7 + $0x30] sm:$0xff]   ;;  %v2816_v63 = vld [vmem:[%s3873_s7 + $0x28] sm:$0xff]   ;;  %v2817_v1 = vld [vmem:[%s3873_s7 + $0x20] sm:$0xff]  }
 0x33d   :  { %v2060_v27 = vrot.slane %v2053_v24, %v3481_v33  ;;  %v2068_v8 = vrot.slane %v2061_v6, %v3481_v33  ;;  %v2112_v12 = vrot.slane %v2105_v18, %v3481_v33  ;;  %v2113_v7 = vcombine.low %v2002_v4, %v2008_v31  ;;  %v2818_v24 = vld [vmem:[%s3873_s7 + $0x18] sm:$0xff]   ;;  %v2819_v6 = vld [vmem:[%s3873_s7 + $0x10] sm:$0xff]   ;;  %v2820_v18 = vld [vmem:[%s3873_s7 + $0x8] sm:$0xff]  }
 0x33e   :  { %v2070_v51 = vcombine.high %v2044_v9, %v2052_v5  ;;  %v2073_v19 = vunpack.c.0.s8 %v2072_v54  ;;  %v2121_v48 = vcombine.low %v2011_v0, %v2017_v61  ;;  %v2129_v15 = vcombine.low %v2014_v39, %v2020_v21  ;;  %v2814_v61 = vld [vmem:[%s3873_s7 + $0x38] sm:$0xff]   ;;  %v2821_v21 = vld [vmem:[%s3873_s7] sm:$0xff]  }
 0x33f   :  { %v2086_v10 = vcombine.high %v2060_v27, %v2068_v8  ;;  %v2120_v49 = vrot.slane %v2113_v7, %v3481_v33  ;;  %v2069_v28 = vcombine.low %v2044_v9, %v2052_v5  ;;  %v2085_v16 = vcombine.low %v2060_v27, %v2068_v8  ;;  %v2536_v54 = vld [vmem:[%s3872_s6] ss:$0 sm:$0xff]  ;;  %s2823_s6 = scalar_lea.vmem %s2494_s14, 256 }
 0x340   :  { %v2076_v40 = vsub.s32 %v2073_v19, %v3472_v55  ;;  %v2128_v42 = vrot.slane %v2121_v48, %v3481_v33  ;;  %v2136_v13 = vrot.slane %v2129_v15, %v3481_v33  ;;  %v2851_v3 = vmov 0.0   ;;  %p2824_p0 = scmp.ne.s32.totalorder %s2494_s14, %s2823_s6  ;;  %p2829_p2 = scmp.lt.s32.totalorder %s2823_s6, %s2823_s6 }
 0x341   :  { %v2138_v36 = vcombine.high %v2112_v12, %v2120_v49  ;;  %v2137_v43 = vcombine.low %v2112_v12, %v2120_v49  ;;  %2623 = vmatprep.subr.bf16.mxu0 %v2851_v3 }
 0x342   :  { %v2084_v2 = vrot.slane %v2070_v51, %v2076_v40  ;;  %v2100_v44 = vrot.slane %v2086_v10, %v2076_v40  ;;  %v2154_v59 = vcombine.high %v2128_v42, %v2136_v13  ;;  %v2077_v57 = vrot.slane %v2069_v28, %v2076_v40  ;;  %v2553_v10 = vld [vmem:[%s3874_s8] ss:$0 sm:$0xff]  ;;  %p2830_p3 = por %p2829_p2, %p2828_p1 }
 0x343   :  { %v2152_v20 = vrot.slane %v2138_v36, %v2076_v40  ;;  %v2093_v55 = vrot.slane %v2085_v16, %v2076_v40  ;;  %v2153_v53 = vcombine.low %v2128_v42, %v2136_v13  ;;  %v2145_v14 = vrot.slane %v2137_v43, %v2076_v40 }
 0x344   :  { %v2104_v30 = vcombine.high %v2084_v2, %v2100_v44  ;;  %v2168_v33 = vrot.slane %v2154_v59, %v2076_v40  ;;  %v2103_v50 = vcombine.low %v2084_v2, %v2100_v44  ;;  %p2831_p4 = pnand %p2830_p3, %p2824_p0 }
 0x345   :  { %v2102_v34 = vcombine.high %v2077_v57, %v2093_v55  ;;  %v2161_v41 = vrot.slane %v2153_v53, %v2076_v40  ;;  %v2101_v22 = vcombine.low %v2077_v57, %v2093_v55 }
 0x346   :  { %v2172_v32 = vcombine.high %v2152_v20, %v2168_v33  ;;  %v2171_v52 = vcombine.low %v2152_v20, %v2168_v33 }
 0x347   :  { %v2170_v46 = vcombine.high %v2145_v14, %v2161_v41  ;;  %v2169_v58 = vcombine.low %v2145_v14, %v2161_v41 }
 0x348   :  { %v2774_v23 = vpack.i.bf16 %v2172_v32, %v2104_v30 }
 0x349   :  { %v2779_v26 = vpack.i.bf16 %v2170_v46, %v2102_v34 }
 0x34a   :  { %2775 = vrot.lane.b32.xlu0 %v2774_v23, %s2848_s3 }
 0x34b   :  { %2780 = vrot.lane.b32.xlu1 %v2779_v26, %s2848_s3 }
 0x3bc   :  { %v2776_v45 = vpop.permute.xlu0 %2775 }
 0x3bd   :  { %v2778_v11 = vunpack.i.h.bf16 %v2776_v45  ;;  %v2777_v62 = vunpack.i.l.bf16 %v2776_v45  ;;  %v2781_v4 = vpop.permute.xlu1 %2780 }
 0x3be   :  { %v2783_v35 = vunpack.i.h.bf16 %v2781_v4  ;;  %v2782_v17 = vunpack.i.l.bf16 %v2781_v4 }
 0x3bf   :  { %v2191_v25 = vsel %vm832_vm7, %v2103_v50, %v2777_v62  ;;  %v2192_v31 = vsel %vm832_vm7, %v2171_v52, %v2778_v11 }
 0x3c0   :  { %v2190_v29 = vsel %vm832_vm7, %v2169_v58, %v2783_v35  ;;  %v2189_v0 = vsel %vm832_vm7, %v2101_v22, %v2782_v17  ;;  %v2194_v39 = vpack.c.bf16 %v2192_v31, %v2191_v25 }
 0x3c1   :  { %v2193_v47 = vpack.c.bf16 %v2190_v29, %v2189_v0 }
 0x3c2   :  { %2362 = vmatprep.mubr.bf16.mxu0 %v2194_v39 }
 0x3c3   :  { %2363 = vmatmul.mubr.bf16.vlgmr.msra.gmra.mxu0 %v2193_v47 }
 0x3c4   :  { %2624 = vmatpush3.bf16.msra.mxu0 %v2814_v61  ;;  %2639 = vmatprep.mubr.msk.bf16.mxu0 %vm2852_vm12, %v2851_v3 }
 0x3c5   :  { %2625 = vmatprep.subr.bf16.mxu0 %v2851_v3 }
 0x3c8   :  { %2626 = vmatpush3.bf16.msra.mxu0 %v2815_v60 }
 0x3c9   :  { %2627 = vmatprep.subr.bf16.mxu0 %v2851_v3 }
 0x3cc   :  { %2628 = vmatpush3.bf16.msra.mxu0 %v2816_v63 }
 0x3cd   :  { %2629 = vmatprep.subr.bf16.mxu0 %v2851_v3 }
 0x3d0   :  { %2630 = vmatpush3.bf16.msra.mxu0 %v2817_v1 }
 0x3d1   :  { %2631 = vmatprep.subr.bf16.mxu0 %v2851_v3 }
 0x3d4   :  { %2632 = vmatpush3.bf16.msra.mxu0 %v2818_v24 }
 0x3d5   :  { %2633 = vmatprep.subr.bf16.mxu0 %v2851_v3 }
 0x3d8   :  { %2634 = vmatpush3.bf16.msra.mxu0 %v2819_v6 }
 0x3d9   :  { %2635 = vmatprep.subr.bf16.mxu0 %v2851_v3 }
 0x3dc   :  { %2636 = vmatpush3.bf16.msra.mxu0 %v2820_v18 }
 0x3dd   :  { %2637 = vmatprep.subr.bf16.mxu0 %v2851_v3 }
 0x3e0   :  { %2638 = vmatpush3.bf16.msra.mxu0 %v2821_v21 }
 0x483   :  { %v2588_v9 = vpop.f32.mrf.mxu0 }
 0x485   :  { %v2589_v5 = vpop.f32.mrf.mxu0 }
 0x486   :  { %v2590_v38 = vadd.f32 %v2589_v5, %v2588_v9 }
 0x487   :  { %v2591_v27 = vpop.f32.mrf.mxu0 }
 0x488   :  { %v2365_v12 = vadd.f32 %v2590_v38, %v2536_v54 }
 0x489   :  { %v2592_v8 = vpop.f32.mrf.mxu0 }
 0x48a   :  { %v2593_v7 = vadd.f32 %v2592_v8, %v2591_v27  ;;  %v2371_v19 = vmax.f32 %v2365_v12, 0.0 }
 0x48c   :  { %v2368_v51 = vadd.f32 %v2593_v7, %v2536_v54 }
 0x48e   :  { %v2372_v48 = vmax.f32 %v2368_v51, 0.0 }
 0x490   :  { %v2373_v15 = vpack.c.bf16 %v2372_v48, %v2371_v19 }
 0x492   :  { %2640 = vmatmul.mubr.bf16.vlgmr.msra.gmra.mxu0 %v2373_v15 }
 0x552   :  { %v2479_v49 = vpop.f32.mrf.mxu0 }
 0x553   :  { %v2480_v28 = vadd.f32 %v2553_v10, %v2479_v49 }
 0x554   :  { %v2641_v16 = vpop.f32.mrf.mxu0 }
 0x555   :  { %2486 = vst [vmem:[#allocation2] sm:$0xff] %v2480_v28 }
 0x556   :  { %v2482_v40 = vpop.f32.mrf.mxu0 }
 0x557   :  { %v2483_v42 = vadd.f32 %v2553_v10, %v2482_v40 }
 0x558   :  { %v2642_v13 = vpop.f32.mrf.mxu0 }
 0x559   :  { %2487 = vst [vmem:[#allocation2 + $0x8] sm:$0xff] %v2483_v42 }
 0x55a   :  { %2834 = shalt.err (!%p2831_p4)
}
 0x55b   :  { %s2854_s15 = smov 128  }
 0x55c   :  { %2499 = dma.vmem_to_hbm [thread:$0]  %s2494_s14, 256, %s3875_s9, [#allocation3], %s2854_s15, %s2854_s15, %s2845_s21  }
 0x55d   :  { %2843 = dma.done.wait [#allocation3], 256  }
 0x55e   :  { %2844 = vsyncadd [#allocation3], 4294967040 }
 0x55f   :  { %2503 = vsyncpa [#allocation3], 1 }

</bundles_post_ra>
